<compile_context>
chip_gen: v6e
topology: v6e:2x2x1
jax: 0.10.0
libtpu: 0.0.40
codegen_flags: <defaults>
</compile_context>

<pallas_src>
import math

import jax
import jax.numpy as jnp
from jax.experimental import pallas as pl
from jax.experimental.pallas import tpu as pltpu

# ----- small config consistent with Classifier(vocab, embed, heads, hidden, layers, out) -----
VOCAB = 128      # 6062 in the original module; small here
EMBED = 64       # 512 in the original module
HEADS = 4
HIDDEN = 128     # 256 in the original module
LAYERS = 2       # 4 in the original module
OUT = 16         # 119 in the original module
OUT_PAD = 128    # lane-dense padded output width
SEQ = 8
BATCH = 2
EPS = 1e-5
DH = EMBED // HEADS
BS = BATCH * SEQ
E3 = 3 * EMBED


def _layernorm(x, g, b):
    mu = jnp.mean(x, axis=-1, keepdims=True)
    var = jnp.mean((x - mu) ** 2, axis=-1, keepdims=True)
    return (x - mu) * jax.lax.rsqrt(var + EPS) * g + b


# ------------------------- fused encoder kernel (grid over layers) -------------------------

def encoder_kernel(x0_ref, wqkv_ref, bqkv_ref, wo_ref, vec_ref,
                   w1_ref, b1_ref, w2_ref, fcw_ref, fcb_ref,
                   o_ref, x_sc):
    li = pl.program_id(0)

    @pl.when(li == 0)
    def _():
        x_sc[...] = x0_ref[...]

    x = x_sc[...]                               # (BS, E) f32, carried across layer grid steps
    vec = vec_ref[0]                            # (8, E) f32 rows: bo, g1, be1, b2, g2, be2, pad

    # ---- fused QKV projection: one MXU matmul per layer (K=E, N=3E), bf16 weights ----
    qkv = jnp.dot(x.astype(jnp.bfloat16), wqkv_ref[0],
                  preferred_element_type=jnp.float32) + bqkv_ref[0]          # (BS, 3E)
    q = qkv[:, 0 * EMBED:1 * EMBED]
    k = qkv[:, 1 * EMBED:2 * EMBED]
    v = qkv[:, 2 * EMBED:3 * EMBED]

    # ---- per-batch attention: (B, S, S) scores; no block-diagonal mask, no wasted MXU work ----
    # Static head loop (HEADS=4). TODO(synk): at real DH=128 the head slices are vreg-aligned;
    # fold (B, H) into one dot_general batch dim there.
    heads = []
    for h in range(HEADS):
        sl = slice(h * DH, (h + 1) * DH)
        qh = q[:, sl].reshape(BATCH, SEQ, DH)
        kh = k[:, sl].reshape(BATCH, SEQ, DH)
        vh = v[:, sl].reshape(BATCH, SEQ, DH)
        s = jnp.einsum('bqd,bkd->bqk', qh, kh,
                       preferred_element_type=jnp.float32)                  # 1/sqrt(DH) folded in
        s = s - jnp.max(s, axis=-1, keepdims=True)
        p = jnp.exp(s)
        p = p * pl.reciprocal(jnp.sum(p, axis=-1, keepdims=True), approx=True)
        oh = jnp.einsum('bqk,bkd->bqd', p, vh,
                        preferred_element_type=jnp.float32)                 # (B, S, DH)
        heads.append(oh.reshape(BS, DH))
    attn_cat = jnp.concatenate(heads, axis=-1)                              # (BS, E)

    # ---- single K=E output projection (accumulation stays inside the MXU) ----
    attn = jnp.dot(attn_cat.astype(jnp.bfloat16), wo_ref[0],
                   preferred_element_type=jnp.float32) + vec[0:1]

    h1 = _layernorm(x + attn, vec[1:2], vec[2:3])                           # post-LN, residual 1

    ff = jnp.dot(h1.astype(jnp.bfloat16), w1_ref[0],
                 preferred_element_type=jnp.float32) + b1_ref[0]
    ff = jnp.maximum(ff, 0.0)                                               # ReLU
    ff = jnp.dot(ff.astype(jnp.bfloat16), w2_ref[0],
                 preferred_element_type=jnp.float32) + vec[3:4]

    x_new = _layernorm(h1 + ff, vec[4:5], vec[5:6])                         # post-LN, residual 2
    x_sc[...] = x_new

    @pl.when(li == LAYERS - 1)
    def _():
        # CLS rows (0, SEQ, 2*SEQ, ...) via a tiny selection matmul, then fc head;
        # output padded to 128 lanes for an unmasked lane-dense store.
        sel_col = jax.lax.broadcasted_iota(jnp.int32, (BATCH, BS), 1)
        sel_row = jax.lax.broadcasted_iota(jnp.int32, (BATCH, BS), 0)
        sel = (sel_col == sel_row * SEQ).astype(jnp.float32)                # (B, BS)
        cls = jnp.dot(sel, x_new, preferred_element_type=jnp.float32)       # (B, E)
        o_ref[...] = jnp.dot(cls.astype(jnp.bfloat16), fcw_ref[...],
                             preferred_element_type=jnp.float32) + fcb_ref[...]


# ------------------------- wrapper -------------------------

def classifier_forward(tokens, packed):
    (emb_table, pos_emb, wqkv, bqkv, wo, vecs, w1, b1, w2, fcw, fcb) = packed

    # Embedding row gather + positional add done by XLA: only the tiny (B*S, E) activation
    # enters VMEM, never the vocab table (no one-hot junk FLOPs).
    # TODO(synk): at the real vocab (6062) fuse this as a scalar-prefetched manual-DMA row
    # gather from an HBM-resident table (PrefetchScalarGridSpec + make_async_copy).
    x0 = (jnp.take(emb_table, tokens.reshape(-1).astype(jnp.int32), axis=0)
          + jnp.tile(pos_emb[:SEQ], (BATCH, 1))).astype(jnp.float32)        # (BS, E)

    inputs = (x0, wqkv, bqkv, wo, vecs, w1, b1, w2, fcw, fcb)
    flops = LAYERS * (2 * BS * EMBED * E3 + HEADS * 4 * BATCH * SEQ * SEQ * DH
                      + 2 * BS * EMBED * EMBED + 4 * BS * EMBED * HIDDEN) \
        + 2 * BATCH * BS * EMBED + 2 * BATCH * EMBED * OUT_PAD
    transcendentals = LAYERS * (HEADS * BATCH * SEQ * SEQ + 2 * BS)
    bytes_accessed = sum(int(a.size) * a.dtype.itemsize for a in inputs) + BATCH * OUT_PAD * 4

    out = pl.pallas_call(
        encoder_kernel,
        out_shape=jax.ShapeDtypeStruct((BATCH, OUT_PAD), jnp.float32),
        grid=(LAYERS,),
        in_specs=[
            pl.BlockSpec((BS, EMBED), lambda li: (0, 0)),                   # x0 (resident)
            pl.BlockSpec((1, EMBED, E3), lambda li: (li, 0, 0)),            # fused Wqkv
            pl.BlockSpec((1, 1, E3), lambda li: (li, 0, 0)),                # fused bqkv
            pl.BlockSpec((1, EMBED, EMBED), lambda li: (li, 0, 0)),         # Wo
            pl.BlockSpec((1, 8, EMBED), lambda li: (li, 0, 0)),             # bias/LN slab
            pl.BlockSpec((1, EMBED, HIDDEN), lambda li: (li, 0, 0)),        # W1
            pl.BlockSpec((1, 1, HIDDEN), lambda li: (li, 0, 0)),            # b1
            pl.BlockSpec((1, HIDDEN, EMBED), lambda li: (li, 0, 0)),        # W2
            pl.BlockSpec((EMBED, OUT_PAD), lambda li: (0, 0)),              # fc W (padded)
            pl.BlockSpec((1, OUT_PAD), lambda li: (0, 0)),                  # fc b (padded)
        ],
        out_specs=pl.BlockSpec((BATCH, OUT_PAD), lambda li: (0, 0)),
        scratch_shapes=[pltpu.VMEM((BS, EMBED), jnp.float32)],              # activation carry
        compiler_params=pltpu.CompilerParams(
            dimension_semantics=("arbitrary",),
            vmem_limit_bytes=16 * 1024 * 1024),
        cost_estimate=pl.CostEstimate(flops=flops, transcendentals=transcendentals,
                                      bytes_accessed=bytes_accessed),
    )(*inputs)
    return out[:, :OUT]


def pack_params(emb_table, pos_emb, layer_params, fc_w, fc_b):
    """One-time parameter transform: fuse QKV, fold 1/sqrt(DH) into Wq/bq, stack per-layer
    weights as bf16 slabs, consolidate bias/LN vectors, pad fc to 128 lanes."""
    scale = 1.0 / math.sqrt(DH)
    wqkv_l, bqkv_l, wo_l, vec_l, w1_l, b1_l, w2_l = [], [], [], [], [], [], []
    for p in layer_params:
        (pwq, pbq, pwk, pbk, pwv, pbv, pwo, pbo,
         g1, be1, pw1, pb1, pw2, pb2, g2, be2) = p
        wqkv_l.append(jnp.concatenate([pwq * scale, pwk, pwv], axis=1))     # (E, 3E)
        bqkv_l.append(jnp.concatenate([pbq * scale, pbk, pbv], axis=1))     # (1, 3E)
        wo_l.append(pwo)
        vec_l.append(jnp.concatenate([pbo, g1, be1, pb2, g2, be2,
                                      jnp.zeros((2, EMBED), jnp.float32)], axis=0))  # (8, E)
        w1_l.append(pw1)
        b1_l.append(pb1)
        w2_l.append(pw2)
    wqkv = jnp.stack(wqkv_l).astype(jnp.bfloat16)
    bqkv = jnp.stack(bqkv_l).astype(jnp.float32)
    wo = jnp.stack(wo_l).astype(jnp.bfloat16)
    vecs = jnp.stack(vec_l).astype(jnp.float32)
    w1 = jnp.stack(w1_l).astype(jnp.bfloat16)
    b1 = jnp.stack(b1_l).astype(jnp.float32)
    w2 = jnp.stack(w2_l).astype(jnp.bfloat16)
    fcw = jnp.zeros((EMBED, OUT_PAD), jnp.float32).at[:, :OUT].set(fc_w).astype(jnp.bfloat16)
    fcb = jnp.zeros((1, OUT_PAD), jnp.float32).at[:, :OUT].set(fc_b)
    return (emb_table.astype(jnp.float32), pos_emb.astype(jnp.float32),
            wqkv, bqkv, wo, vecs, w1, b1, w2, fcw, fcb)


# ------------------------- pure-JAX reference (for verification) -------------------------

def _round_bf16(w):
    return w.astype(jnp.bfloat16).astype(jnp.float32)


def _ref_layer(x, p):
    wq, bq, wk, bk, wv, bv, wo, bo, g1, be1, w1, b1, w2, b2, g2, be2 = p
    q = x @ _round_bf16(wq) + bq
    k = x @ _round_bf16(wk) + bk
    v = x @ _round_bf16(wv) + bv
    outs = []
    for h in range(HEADS):
        qh = q[..., h * DH:(h + 1) * DH]
        kh = k[..., h * DH:(h + 1) * DH]
        vh = v[..., h * DH:(h + 1) * DH]
        s = jnp.einsum('bqd,bkd->bqk', qh, kh) / math.sqrt(DH)
        outs.append(jnp.einsum('bqk,bkd->bqd', jax.nn.softmax(s, axis=-1), vh))
    attn = jnp.concatenate(outs, -1) @ _round_bf16(wo) + bo
    h1 = _layernorm(x + attn, g1[0], be1[0])
    ff = jnp.maximum(h1 @ _round_bf16(w1) + b1, 0.0) @ _round_bf16(w2) + b2
    return _layernorm(h1 + ff, g2[0], be2[0])


def reference_forward(tokens, emb_table, pos_emb, layer_params, fc_w, fc_b):
    x = jnp.take(emb_table, tokens, axis=0) + pos_emb[None, :tokens.shape[1], :]
    for p in layer_params:
        x = _ref_layer(x, p)
    return x[:, 0, :] @ _round_bf16(fc_w) + fc_b


# ------------------------- parameter init -------------------------

def init_params(key):
    def nrm(k, shape, scale=0.02):
        return (scale * jax.random.normal(k, shape)).astype(jnp.float32)

    keys = jax.random.split(key, 4 + LAYERS)
    emb_table = nrm(keys[0], (VOCAB, EMBED))
    pos_emb = nrm(keys[1], (SEQ, EMBED))
    fc_w = nrm(keys[2], (EMBED, OUT))
    fc_b = nrm(keys[3], (1, OUT))

    layer_params = []
    for li in range(LAYERS):
        ks = jax.random.split(keys[4 + li], 10)
        p = (
            nrm(ks[0], (EMBED, EMBED)), nrm(ks[1], (1, EMBED)),        # Wq, bq
            nrm(ks[2], (EMBED, EMBED)), nrm(ks[3], (1, EMBED)),        # Wk, bk
            nrm(ks[4], (EMBED, EMBED)), nrm(ks[5], (1, EMBED)),        # Wv, bv
            nrm(ks[6], (EMBED, EMBED)), nrm(ks[7], (1, EMBED)),        # Wo, bo
            jnp.ones((1, EMBED), jnp.float32), jnp.zeros((1, EMBED), jnp.float32),  # LN1
            nrm(ks[8], (EMBED, HIDDEN)), jnp.zeros((1, HIDDEN), jnp.float32),       # W1, b1
            nrm(ks[9], (HIDDEN, EMBED)), jnp.zeros((1, EMBED), jnp.float32),        # W2, b2
            jnp.ones((1, EMBED), jnp.float32), jnp.zeros((1, EMBED), jnp.float32),  # LN2
        )
        layer_params.append(p)
    return emb_table, pos_emb, layer_params, fc_w, fc_b


if __name__ == "__main__":
    key = jax.random.PRNGKey(0)
    k_tok, k_par = jax.random.split(key)
    tokens = jax.random.randint(k_tok, (BATCH, SEQ), 0, VOCAB, dtype=jnp.int32)

    emb_table, pos_emb, layer_params, fc_w, fc_b = init_params(k_par)
    packed = pack_params(emb_table, pos_emb, layer_params, fc_w, fc_b)

    out = classifier_forward(tokens, packed)
    out = jax.block_until_ready(out)
    assert out.shape == (BATCH, OUT), out.shape

    ref = jax.block_until_ready(
        reference_forward(tokens, emb_table, pos_emb, layer_params, fc_w, fc_b))
    # tolerance accounts for bf16-cast matmul activations and the approximate EUP reciprocal
    # in the softmax denominator (weights are bf16-rounded identically in the reference).
    err = float(jnp.max(jnp.abs(out - ref)))
    assert jnp.allclose(out, ref, atol=2e-2, rtol=2e-2), err

    print("KERNEL_OK")
</pallas_src>

<mosaic_0001>
module attributes {stable_mosaic.version = 11 : i64} {
  func.func @encoder_kernel(%arg0: i32, %arg1: memref<16x64xf32, #tpu.memory_space<vmem>>, %arg2: memref<1x64x192xbf16, #tpu.memory_space<vmem>>, %arg3: memref<1x1x192xf32, #tpu.memory_space<vmem>>, %arg4: memref<1x64x64xbf16, #tpu.memory_space<vmem>>, %arg5: memref<1x8x64xf32, #tpu.memory_space<vmem>>, %arg6: memref<1x64x128xbf16, #tpu.memory_space<vmem>>, %arg7: memref<1x1x128xf32, #tpu.memory_space<vmem>>, %arg8: memref<1x128x64xbf16, #tpu.memory_space<vmem>>, %arg9: memref<64x128xbf16, #tpu.memory_space<vmem>>, %arg10: memref<1x128xf32, #tpu.memory_space<vmem>>, %arg11: memref<2x128xf32, #tpu.memory_space<vmem>>, %arg12: memref<16x64xf32, #tpu.memory_space<vmem>>) attributes {dimension_semantics = [#tpu.dimension_semantics<arbitrary>], iteration_bounds = array<i64: 2>, scalar_prefetch = 0 : i64, scratch_operands = 1 : i64, tpu.core_type = #tpu.core_type<tc>, window_params = [{pipeline_mode = #tpu.pipeline_mode<synchronous>, transform_indices = @transform_0, window_bounds = array<i64: 16, 64>}, {transform_indices = @transform_1, window_bounds = array<i64: 1, 64, 192>}, {transform_indices = @transform_2, window_bounds = array<i64: 1, 1, 192>}, {transform_indices = @transform_3, window_bounds = array<i64: 1, 64, 64>}, {transform_indices = @transform_4, window_bounds = array<i64: 1, 8, 64>}, {transform_indices = @transform_5, window_bounds = array<i64: 1, 64, 128>}, {transform_indices = @transform_6, window_bounds = array<i64: 1, 1, 128>}, {transform_indices = @transform_7, window_bounds = array<i64: 1, 128, 64>}, {pipeline_mode = #tpu.pipeline_mode<synchronous>, transform_indices = @transform_8, window_bounds = array<i64: 64, 128>}, {pipeline_mode = #tpu.pipeline_mode<synchronous>, transform_indices = @transform_9, window_bounds = array<i64: 1, 128>}, {pipeline_mode = #tpu.pipeline_mode<synchronous>, transform_indices = @transform_10, window_bounds = array<i64: 2, 128>}]} {
    %c0_i32 = arith.constant 0 : i32
    %0 = arith.cmpi eq, %arg0, %c0_i32 : i32
    %1 = arith.extui %0 : i1 to i32
    %c0_i32_0 = arith.constant 0 : i32
    %2 = arith.cmpi ne, %1, %c0_i32_0 : i32
    scf.if %2 {
      %c0_56 = arith.constant 0 : index
      %c0_57 = arith.constant 0 : index
      %172 = vector.load %arg1[%c0_56, %c0_57] : memref<16x64xf32, #tpu.memory_space<vmem>>, vector<16x64xf32>
      %c0_58 = arith.constant 0 : index
      %c0_59 = arith.constant 0 : index
      %173 = vector.load %arg12[%c0_58, %c0_59] : memref<16x64xf32, #tpu.memory_space<vmem>>, vector<16x64xf32>
      tpu.vector_store %arg12[%c0_58, %c0_59], %172 {strides = array<i32>} : memref<16x64xf32, #tpu.memory_space<vmem>>, vector<16x64xf32>,
    } else {
    }
    %c0 = arith.constant 0 : index
    %c0_1 = arith.constant 0 : index
    %3 = vector.load %arg12[%c0, %c0_1] : memref<16x64xf32, #tpu.memory_space<vmem>>, vector<16x64xf32>
    %c0_2 = arith.constant 0 : index
    %c0_3 = arith.constant 0 : index
    %c0_4 = arith.constant 0 : index
    %4 = vector.load %arg5[%c0_2, %c0_3, %c0_4] : memref<1x8x64xf32, #tpu.memory_space<vmem>>, vector<1x8x64xf32>
    %5 = vector.shape_cast %4 : vector<1x8x64xf32> to vector<8x64xf32>
    %6 = arith.truncf %3 : vector<16x64xf32> to vector<16x64xbf16>
    %c0_5 = arith.constant 0 : index
    %c0_6 = arith.constant 0 : index
    %c0_7 = arith.constant 0 : index
    %7 = vector.load %arg2[%c0_5, %c0_6, %c0_7] : memref<1x64x192xbf16, #tpu.memory_space<vmem>>, vector<1x64x192xbf16>
    %8 = vector.shape_cast %7 : vector<1x64x192xbf16> to vector<64x192xbf16>
    %cst = arith.constant dense<0.000000e+00> : vector<16x192xf32>
    %9 = tpu.matmul %6, %8, %cst {dimension_numbers = #tpu.dot_dimension_numbers<[1], [0], [0], [1], [0, 0, 1, 1], [], []>} : vector<16x64xbf16>, vector<64x192xbf16>, vector<16x192xf32> -> vector<16x192xf32>
    %c0_8 = arith.constant 0 : index
    %c0_9 = arith.constant 0 : index
    %c0_10 = arith.constant 0 : index
    %10 = vector.load %arg3[%c0_8, %c0_9, %c0_10] : memref<1x1x192xf32, #tpu.memory_space<vmem>>, vector<1x1x192xf32>
    %11 = vector.shape_cast %10 : vector<1x1x192xf32> to vector<1x192xf32>
    %12 = vector.broadcast %11 : vector<1x192xf32> to vector<16x192xf32>
    %13 = arith.addf %9, %12 : vector<16x192xf32>
    %14 = vector.extract_strided_slice %13 {offsets = [0, 0], sizes = [16, 64], strides = [1, 1]} : vector<16x192xf32> to vector<16x64xf32>
    %15 = vector.extract_strided_slice %13 {offsets = [0, 64], sizes = [16, 64], strides = [1, 1]} : vector<16x192xf32> to vector<16x64xf32>
    %16 = vector.extract_strided_slice %13 {offsets = [0, 128], sizes = [16, 64], strides = [1, 1]} : vector<16x192xf32> to vector<16x64xf32>
    %17 = vector.extract_strided_slice %14 {offsets = [0, 0], sizes = [16, 16], strides = [1, 1]} : vector<16x64xf32> to vector<16x16xf32>
    %18 = vector.shape_cast %17 : vector<16x16xf32> to vector<2x8x16xf32>
    %19 = vector.extract_strided_slice %15 {offsets = [0, 0], sizes = [16, 16], strides = [1, 1]} : vector<16x64xf32> to vector<16x16xf32>
    %20 = vector.shape_cast %19 : vector<16x16xf32> to vector<2x8x16xf32>
    %21 = vector.extract_strided_slice %16 {offsets = [0, 0], sizes = [16, 16], strides = [1, 1]} : vector<16x64xf32> to vector<16x16xf32>
    %22 = vector.shape_cast %21 : vector<16x16xf32> to vector<2x8x16xf32>
    "tpu.trace_start"() <{level = 10 : i32, message = "bqd,bkd->bqk"}> : () -> ()
    %cst_11 = arith.constant dense<0.000000e+00> : vector<2x8x8xf32>
    %23 = tpu.matmul %18, %20, %cst_11 {dimension_numbers = #tpu.dot_dimension_numbers<[2], [2], [1], [1], [0, 0, 0, 1, 1, 1], [0], [0]>} : vector<2x8x16xf32>, vector<2x8x16xf32>, vector<2x8x8xf32> -> vector<2x8x8xf32>
    "tpu.trace_stop"() : () -> ()
    %cst_12 = arith.constant dense<0xFF800000> : vector<2x8xf32>
    %24 = vector.multi_reduction <maximumf>, %23, %cst_12 [2] : vector<2x8x8xf32> to vector<2x8xf32>
    %25 = vector.shape_cast %24 : vector<2x8xf32> to vector<2x8x1xf32>
    %26 = vector.broadcast %25 : vector<2x8x1xf32> to vector<2x8x8xf32>
    %27 = arith.subf %23, %26 : vector<2x8x8xf32>
    %28 = math.exp %27 : vector<2x8x8xf32>
    %cst_13 = arith.constant dense<0.000000e+00> : vector<2x8xf32>
    %29 = vector.multi_reduction <add>, %28, %cst_13 [2] : vector<2x8x8xf32> to vector<2x8xf32>
    %30 = vector.shape_cast %29 : vector<2x8xf32> to vector<2x8x1xf32>
    %31 = tpu.reciprocal %30 {approx = true} : vector<2x8x1xf32> -> vector<2x8x1xf32>
    %32 = vector.broadcast %31 : vector<2x8x1xf32> to vector<2x8x8xf32>
    %33 = arith.mulf %28, %32 : vector<2x8x8xf32>
    "tpu.trace_start"() <{level = 10 : i32, message = "bqk,bkd->bqd"}> : () -> ()
    %cst_14 = arith.constant dense<0.000000e+00> : vector<2x8x16xf32>
    %34 = tpu.matmul %33, %22, %cst_14 {dimension_numbers = #tpu.dot_dimension_numbers<[2], [1], [1], [2], [0, 0, 0, 1, 1, 2], [0], [0]>} : vector<2x8x8xf32>, vector<2x8x16xf32>, vector<2x8x16xf32> -> vector<2x8x16xf32>
    "tpu.trace_stop"() : () -> ()
    %35 = vector.shape_cast %34 : vector<2x8x16xf32> to vector<16x16xf32>
    %36 = vector.extract_strided_slice %14 {offsets = [0, 16], sizes = [16, 16], strides = [1, 1]} : vector<16x64xf32> to vector<16x16xf32>
    %37 = vector.shape_cast %36 : vector<16x16xf32> to vector<2x8x16xf32>
    %38 = vector.extract_strided_slice %15 {offsets = [0, 16], sizes = [16, 16], strides = [1, 1]} : vector<16x64xf32> to vector<16x16xf32>
    %39 = vector.shape_cast %38 : vector<16x16xf32> to vector<2x8x16xf32>
    %40 = vector.extract_strided_slice %16 {offsets = [0, 16], sizes = [16, 16], strides = [1, 1]} : vector<16x64xf32> to vector<16x16xf32>
    %41 = vector.shape_cast %40 : vector<16x16xf32> to vector<2x8x16xf32>
    "tpu.trace_start"() <{level = 10 : i32, message = "bqd,bkd->bqk"}> : () -> ()
    %cst_15 = arith.constant dense<0.000000e+00> : vector<2x8x8xf32>
    %42 = tpu.matmul %37, %39, %cst_15 {dimension_numbers = #tpu.dot_dimension_numbers<[2], [2], [1], [1], [0, 0, 0, 1, 1, 1], [0], [0]>} : vector<2x8x16xf32>, vector<2x8x16xf32>, vector<2x8x8xf32> -> vector<2x8x8xf32>
    "tpu.trace_stop"() : () -> ()
    %cst_16 = arith.constant dense<0xFF800000> : vector<2x8xf32>
    %43 = vector.multi_reduction <maximumf>, %42, %cst_16 [2] : vector<2x8x8xf32> to vector<2x8xf32>
    %44 = vector.shape_cast %43 : vector<2x8xf32> to vector<2x8x1xf32>
    %45 = vector.broadcast %44 : vector<2x8x1xf32> to vector<2x8x8xf32>
    %46 = arith.subf %42, %45 : vector<2x8x8xf32>
    %47 = math.exp %46 : vector<2x8x8xf32>
    %cst_17 = arith.constant dense<0.000000e+00> : vector<2x8xf32>
    %48 = vector.multi_reduction <add>, %47, %cst_17 [2] : vector<2x8x8xf32> to vector<2x8xf32>
    %49 = vector.shape_cast %48 : vector<2x8xf32> to vector<2x8x1xf32>
    %50 = tpu.reciprocal %49 {approx = true} : vector<2x8x1xf32> -> vector<2x8x1xf32>
    %51 = vector.broadcast %50 : vector<2x8x1xf32> to vector<2x8x8xf32>
    %52 = arith.mulf %47, %51 : vector<2x8x8xf32>
    "tpu.trace_start"() <{level = 10 : i32, message = "bqk,bkd->bqd"}> : () -> ()
    %cst_18 = arith.constant dense<0.000000e+00> : vector<2x8x16xf32>
    %53 = tpu.matmul %52, %41, %cst_18 {dimension_numbers = #tpu.dot_dimension_numbers<[2], [1], [1], [2], [0, 0, 0, 1, 1, 2], [0], [0]>} : vector<2x8x8xf32>, vector<2x8x16xf32>, vector<2x8x16xf32> -> vector<2x8x16xf32>
    "tpu.trace_stop"() : () -> ()
    %54 = vector.shape_cast %53 : vector<2x8x16xf32> to vector<16x16xf32>
    %55 = vector.extract_strided_slice %14 {offsets = [0, 32], sizes = [16, 16], strides = [1, 1]} : vector<16x64xf32> to vector<16x16xf32>
    %56 = vector.shape_cast %55 : vector<16x16xf32> to vector<2x8x16xf32>
    %57 = vector.extract_strided_slice %15 {offsets = [0, 32], sizes = [16, 16], strides = [1, 1]} : vector<16x64xf32> to vector<16x16xf32>
    %58 = vector.shape_cast %57 : vector<16x16xf32> to vector<2x8x16xf32>
    %59 = vector.extract_strided_slice %16 {offsets = [0, 32], sizes = [16, 16], strides = [1, 1]} : vector<16x64xf32> to vector<16x16xf32>
    %60 = vector.shape_cast %59 : vector<16x16xf32> to vector<2x8x16xf32>
    "tpu.trace_start"() <{level = 10 : i32, message = "bqd,bkd->bqk"}> : () -> ()
    %cst_19 = arith.constant dense<0.000000e+00> : vector<2x8x8xf32>
    %61 = tpu.matmul %56, %58, %cst_19 {dimension_numbers = #tpu.dot_dimension_numbers<[2], [2], [1], [1], [0, 0, 0, 1, 1, 1], [0], [0]>} : vector<2x8x16xf32>, vector<2x8x16xf32>, vector<2x8x8xf32> -> vector<2x8x8xf32>
    "tpu.trace_stop"() : () -> ()
    %cst_20 = arith.constant dense<0xFF800000> : vector<2x8xf32>
    %62 = vector.multi_reduction <maximumf>, %61, %cst_20 [2] : vector<2x8x8xf32> to vector<2x8xf32>
    %63 = vector.shape_cast %62 : vector<2x8xf32> to vector<2x8x1xf32>
    %64 = vector.broadcast %63 : vector<2x8x1xf32> to vector<2x8x8xf32>
    %65 = arith.subf %61, %64 : vector<2x8x8xf32>
    %66 = math.exp %65 : vector<2x8x8xf32>
    %cst_21 = arith.constant dense<0.000000e+00> : vector<2x8xf32>
    %67 = vector.multi_reduction <add>, %66, %cst_21 [2] : vector<2x8x8xf32> to vector<2x8xf32>
    %68 = vector.shape_cast %67 : vector<2x8xf32> to vector<2x8x1xf32>
    %69 = tpu.reciprocal %68 {approx = true} : vector<2x8x1xf32> -> vector<2x8x1xf32>
    %70 = vector.broadcast %69 : vector<2x8x1xf32> to vector<2x8x8xf32>
    %71 = arith.mulf %66, %70 : vector<2x8x8xf32>
    "tpu.trace_start"() <{level = 10 : i32, message = "bqk,bkd->bqd"}> : () -> ()
    %cst_22 = arith.constant dense<0.000000e+00> : vector<2x8x16xf32>
    %72 = tpu.matmul %71, %60, %cst_22 {dimension_numbers = #tpu.dot_dimension_numbers<[2], [1], [1], [2], [0, 0, 0, 1, 1, 2], [0], [0]>} : vector<2x8x8xf32>, vector<2x8x16xf32>, vector<2x8x16xf32> -> vector<2x8x16xf32>
    "tpu.trace_stop"() : () -> ()
    %73 = vector.shape_cast %72 : vector<2x8x16xf32> to vector<16x16xf32>
    %74 = vector.extract_strided_slice %14 {offsets = [0, 48], sizes = [16, 16], strides = [1, 1]} : vector<16x64xf32> to vector<16x16xf32>
    %75 = vector.shape_cast %74 : vector<16x16xf32> to vector<2x8x16xf32>
    %76 = vector.extract_strided_slice %15 {offsets = [0, 48], sizes = [16, 16], strides = [1, 1]} : vector<16x64xf32> to vector<16x16xf32>
    %77 = vector.shape_cast %76 : vector<16x16xf32> to vector<2x8x16xf32>
    %78 = vector.extract_strided_slice %16 {offsets = [0, 48], sizes = [16, 16], strides = [1, 1]} : vector<16x64xf32> to vector<16x16xf32>
    %79 = vector.shape_cast %78 : vector<16x16xf32> to vector<2x8x16xf32>
    "tpu.trace_start"() <{level = 10 : i32, message = "bqd,bkd->bqk"}> : () -> ()
    %cst_23 = arith.constant dense<0.000000e+00> : vector<2x8x8xf32>
    %80 = tpu.matmul %75, %77, %cst_23 {dimension_numbers = #tpu.dot_dimension_numbers<[2], [2], [1], [1], [0, 0, 0, 1, 1, 1], [0], [0]>} : vector<2x8x16xf32>, vector<2x8x16xf32>, vector<2x8x8xf32> -> vector<2x8x8xf32>
    "tpu.trace_stop"() : () -> ()
    %cst_24 = arith.constant dense<0xFF800000> : vector<2x8xf32>
    %81 = vector.multi_reduction <maximumf>, %80, %cst_24 [2] : vector<2x8x8xf32> to vector<2x8xf32>
    %82 = vector.shape_cast %81 : vector<2x8xf32> to vector<2x8x1xf32>
    %83 = vector.broadcast %82 : vector<2x8x1xf32> to vector<2x8x8xf32>
    %84 = arith.subf %80, %83 : vector<2x8x8xf32>
    %85 = math.exp %84 : vector<2x8x8xf32>
    %cst_25 = arith.constant dense<0.000000e+00> : vector<2x8xf32>
    %86 = vector.multi_reduction <add>, %85, %cst_25 [2] : vector<2x8x8xf32> to vector<2x8xf32>
    %87 = vector.shape_cast %86 : vector<2x8xf32> to vector<2x8x1xf32>
    %88 = tpu.reciprocal %87 {approx = true} : vector<2x8x1xf32> -> vector<2x8x1xf32>
    %89 = vector.broadcast %88 : vector<2x8x1xf32> to vector<2x8x8xf32>
    %90 = arith.mulf %85, %89 : vector<2x8x8xf32>
    "tpu.trace_start"() <{level = 10 : i32, message = "bqk,bkd->bqd"}> : () -> ()
    %cst_26 = arith.constant dense<0.000000e+00> : vector<2x8x16xf32>
    %91 = tpu.matmul %90, %79, %cst_26 {dimension_numbers = #tpu.dot_dimension_numbers<[2], [1], [1], [2], [0, 0, 0, 1, 1, 2], [0], [0]>} : vector<2x8x8xf32>, vector<2x8x16xf32>, vector<2x8x16xf32> -> vector<2x8x16xf32>
    "tpu.trace_stop"() : () -> ()
    %92 = vector.shape_cast %91 : vector<2x8x16xf32> to vector<16x16xf32>
    %93 = tpu.concatenate %35, %54, %73, %92 in 1 : vector<16x16xf32>, vector<16x16xf32>, vector<16x16xf32>, vector<16x16xf32> -> vector<16x64xf32>
    %94 = arith.truncf %93 : vector<16x64xf32> to vector<16x64xbf16>
    %c0_27 = arith.constant 0 : index
    %c0_28 = arith.constant 0 : index
    %c0_29 = arith.constant 0 : index
    %95 = vector.load %arg4[%c0_27, %c0_28, %c0_29] : memref<1x64x64xbf16, #tpu.memory_space<vmem>>, vector<1x64x64xbf16>
    %96 = vector.shape_cast %95 : vector<1x64x64xbf16> to vector<64x64xbf16>
    %cst_30 = arith.constant dense<0.000000e+00> : vector<16x64xf32>
    %97 = tpu.matmul %94, %96, %cst_30 {dimension_numbers = #tpu.dot_dimension_numbers<[1], [0], [0], [1], [0, 0, 1, 1], [], []>} : vector<16x64xbf16>, vector<64x64xbf16>, vector<16x64xf32> -> vector<16x64xf32>
    %98 = vector.extract_strided_slice %5 {offsets = [0, 0], sizes = [1, 64], strides = [1, 1]} : vector<8x64xf32> to vector<1x64xf32>
    %99 = vector.broadcast %98 : vector<1x64xf32> to vector<16x64xf32>
    %100 = arith.addf %97, %99 : vector<16x64xf32>
    %101 = arith.addf %3, %100 : vector<16x64xf32>
    %102 = vector.extract_strided_slice %5 {offsets = [1, 0], sizes = [1, 64], strides = [1, 1]} : vector<8x64xf32> to vector<1x64xf32>
    %103 = vector.extract_strided_slice %5 {offsets = [2, 0], sizes = [1, 64], strides = [1, 1]} : vector<8x64xf32> to vector<1x64xf32>
    %cst_31 = arith.constant dense<0.000000e+00> : vector<16xf32>
    %104 = vector.multi_reduction <add>, %101, %cst_31 [1] : vector<16x64xf32> to vector<16xf32>
    %105 = vector.shape_cast %104 : vector<16xf32> to vector<16x1xf32>
    %cst_32 = arith.constant 6.400000e+01 : f32
    %106 = vector.broadcast %cst_32 : f32 to vector<16x1xf32>
    %107 = arith.divf %105, %106 : vector<16x1xf32>
    %108 = vector.broadcast %107 : vector<16x1xf32> to vector<16x64xf32>
    %109 = arith.subf %101, %108 : vector<16x64xf32>
    %110 = arith.mulf %109, %109 : vector<16x64xf32>
    %cst_33 = arith.constant dense<0.000000e+00> : vector<16xf32>
    %111 = vector.multi_reduction <add>, %110, %cst_33 [1] : vector<16x64xf32> to vector<16xf32>
    %112 = vector.shape_cast %111 : vector<16xf32> to vector<16x1xf32>
    %cst_34 = arith.constant 6.400000e+01 : f32
    %113 = vector.broadcast %cst_34 : f32 to vector<16x1xf32>
    %114 = arith.divf %112, %113 : vector<16x1xf32>
    %115 = vector.broadcast %107 : vector<16x1xf32> to vector<16x64xf32>
    %116 = arith.subf %101, %115 : vector<16x64xf32>
    %cst_35 = arith.constant 9.99999974E-6 : f32
    %117 = vector.broadcast %cst_35 : f32 to vector<16x1xf32>
    %118 = arith.addf %114, %117 : vector<16x1xf32>
    %119 = math.rsqrt %118 : vector<16x1xf32>
    %120 = vector.broadcast %119 : vector<16x1xf32> to vector<16x64xf32>
    %121 = arith.mulf %116, %120 : vector<16x64xf32>
    %122 = vector.broadcast %102 : vector<1x64xf32> to vector<16x64xf32>
    %123 = arith.mulf %121, %122 : vector<16x64xf32>
    %124 = vector.broadcast %103 : vector<1x64xf32> to vector<16x64xf32>
    %125 = arith.addf %123, %124 : vector<16x64xf32>
    %126 = arith.truncf %125 : vector<16x64xf32> to vector<16x64xbf16>
    %c0_36 = arith.constant 0 : index
    %c0_37 = arith.constant 0 : index
    %c0_38 = arith.constant 0 : index
    %127 = vector.load %arg6[%c0_36, %c0_37, %c0_38] : memref<1x64x128xbf16, #tpu.memory_space<vmem>>, vector<1x64x128xbf16>
    %128 = vector.shape_cast %127 : vector<1x64x128xbf16> to vector<64x128xbf16>
    %cst_39 = arith.constant dense<0.000000e+00> : vector<16x128xf32>
    %129 = tpu.matmul %126, %128, %cst_39 {dimension_numbers = #tpu.dot_dimension_numbers<[1], [0], [0], [1], [0, 0, 1, 1], [], []>} : vector<16x64xbf16>, vector<64x128xbf16>, vector<16x128xf32> -> vector<16x128xf32>
    %c0_40 = arith.constant 0 : index
    %c0_41 = arith.constant 0 : index
    %c0_42 = arith.constant 0 : index
    %130 = vector.load %arg7[%c0_40, %c0_41, %c0_42] : memref<1x1x128xf32, #tpu.memory_space<vmem>>, vector<1x1x128xf32>
    %131 = vector.shape_cast %130 : vector<1x1x128xf32> to vector<1x128xf32>
    %132 = vector.broadcast %131 : vector<1x128xf32> to vector<16x128xf32>
    %133 = arith.addf %129, %132 : vector<16x128xf32>
    %cst_43 = arith.constant 0.000000e+00 : f32
    %134 = vector.broadcast %cst_43 : f32 to vector<16x128xf32>
    %135 = arith.maximumf %133, %134 : vector<16x128xf32>
    %136 = arith.truncf %135 : vector<16x128xf32> to vector<16x128xbf16>
    %c0_44 = arith.constant 0 : index
    %c0_45 = arith.constant 0 : index
    %c0_46 = arith.constant 0 : index
    %137 = vector.load %arg8[%c0_44, %c0_45, %c0_46] : memref<1x128x64xbf16, #tpu.memory_space<vmem>>, vector<1x128x64xbf16>
    %138 = vector.shape_cast %137 : vector<1x128x64xbf16> to vector<128x64xbf16>
    %cst_47 = arith.constant dense<0.000000e+00> : vector<16x64xf32>
    %139 = tpu.matmul %136, %138, %cst_47 {dimension_numbers = #tpu.dot_dimension_numbers<[1], [0], [0], [1], [0, 0, 1, 1], [], []>} : vector<16x128xbf16>, vector<128x64xbf16>, vector<16x64xf32> -> vector<16x64xf32>
    %140 = vector.extract_strided_slice %5 {offsets = [3, 0], sizes = [1, 64], strides = [1, 1]} : vector<8x64xf32> to vector<1x64xf32>
    %141 = vector.broadcast %140 : vector<1x64xf32> to vector<16x64xf32>
    %142 = arith.addf %139, %141 : vector<16x64xf32>
    %143 = arith.addf %125, %142 : vector<16x64xf32>
    %144 = vector.extract_strided_slice %5 {offsets = [4, 0], sizes = [1, 64], strides = [1, 1]} : vector<8x64xf32> to vector<1x64xf32>
    %145 = vector.extract_strided_slice %5 {offsets = [5, 0], sizes = [1, 64], strides = [1, 1]} : vector<8x64xf32> to vector<1x64xf32>
    %cst_48 = arith.constant dense<0.000000e+00> : vector<16xf32>
    %146 = vector.multi_reduction <add>, %143, %cst_48 [1] : vector<16x64xf32> to vector<16xf32>
    %147 = vector.shape_cast %146 : vector<16xf32> to vector<16x1xf32>
    %cst_49 = arith.constant 6.400000e+01 : f32
    %148 = vector.broadcast %cst_49 : f32 to vector<16x1xf32>
    %149 = arith.divf %147, %148 : vector<16x1xf32>
    %150 = vector.broadcast %149 : vector<16x1xf32> to vector<16x64xf32>
    %151 = arith.subf %143, %150 : vector<16x64xf32>
    %152 = arith.mulf %151, %151 : vector<16x64xf32>
    %cst_50 = arith.constant dense<0.000000e+00> : vector<16xf32>
    %153 = vector.multi_reduction <add>, %152, %cst_50 [1] : vector<16x64xf32> to vector<16xf32>
    %154 = vector.shape_cast %153 : vector<16xf32> to vector<16x1xf32>
    %cst_51 = arith.constant 6.400000e+01 : f32
    %155 = vector.broadcast %cst_51 : f32 to vector<16x1xf32>
    %156 = arith.divf %154, %155 : vector<16x1xf32>
    %157 = vector.broadcast %149 : vector<16x1xf32> to vector<16x64xf32>
    %158 = arith.subf %143, %157 : vector<16x64xf32>
    %cst_52 = arith.constant 9.99999974E-6 : f32
    %159 = vector.broadcast %cst_52 : f32 to vector<16x1xf32>
    %160 = arith.addf %156, %159 : vector<16x1xf32>
    %161 = math.rsqrt %160 : vector<16x1xf32>
    %162 = vector.broadcast %161 : vector<16x1xf32> to vector<16x64xf32>
    %163 = arith.mulf %158, %162 : vector<16x64xf32>
    %164 = vector.broadcast %144 : vector<1x64xf32> to vector<16x64xf32>
    %165 = arith.mulf %163, %164 : vector<16x64xf32>
    %166 = vector.broadcast %145 : vector<1x64xf32> to vector<16x64xf32>
    %167 = arith.addf %165, %166 : vector<16x64xf32>
    %c0_53 = arith.constant 0 : index
    %c0_54 = arith.constant 0 : index
    %168 = vector.load %arg12[%c0_53, %c0_54] : memref<16x64xf32, #tpu.memory_space<vmem>>, vector<16x64xf32>
    tpu.vector_store %arg12[%c0_53, %c0_54], %167 {strides = array<i32>} : memref<16x64xf32, #tpu.memory_space<vmem>>, vector<16x64xf32>,
    %c1_i32 = arith.constant 1 : i32
    %169 = arith.cmpi eq, %arg0, %c1_i32 : i32
    %170 = arith.extui %169 : i1 to i32
    %c0_i32_55 = arith.constant 0 : i32
    %171 = arith.cmpi ne, %170, %c0_i32_55 : i32
    scf.if %171 {
      %172 = tpu.iota {dimensions = array<i32: 1>} : vector<2x16xi32>
      %173 = tpu.iota {dimensions = array<i32: 0>} : vector<2x16xi32>
      %c8_i32 = arith.constant 8 : i32
      %174 = vector.broadcast %c8_i32 : i32 to vector<2x16xi32>
      %175 = arith.muli %173, %174 : vector<2x16xi32>
      %176 = arith.cmpi eq, %172, %175 : vector<2x16xi32>
      %177 = arith.extui %176 : vector<2x16xi1> to vector<2x16xi32>
      %178 = arith.sitofp %177 : vector<2x16xi32> to vector<2x16xf32>
      %cst_56 = arith.constant dense<0.000000e+00> : vector<2x64xf32>
      %179 = tpu.matmul %178, %167, %cst_56 {dimension_numbers = #tpu.dot_dimension_numbers<[1], [0], [0], [1], [0, 0, 1, 1], [], []>} : vector<2x16xf32>, vector<16x64xf32>, vector<2x64xf32> -> vector<2x64xf32>
      %180 = arith.truncf %179 : vector<2x64xf32> to vector<2x64xbf16>
      %c0_57 = arith.constant 0 : index
      %c0_58 = arith.constant 0 : index
      %181 = vector.load %arg9[%c0_57, %c0_58] : memref<64x128xbf16, #tpu.memory_space<vmem>>, vector<64x128xbf16>
      %cst_59 = arith.constant dense<0.000000e+00> : vector<2x128xf32>
      %182 = tpu.matmul %180, %181, %cst_59 {dimension_numbers = #tpu.dot_dimension_numbers<[1], [0], [0], [1], [0, 0, 1, 1], [], []>} : vector<2x64xbf16>, vector<64x128xbf16>, vector<2x128xf32> -> vector<2x128xf32>
      %c0_60 = arith.constant 0 : index
      %c0_61 = arith.constant 0 : index
      %183 = vector.load %arg10[%c0_60, %c0_61] : memref<1x128xf32, #tpu.memory_space<vmem>>, vector<1x128xf32>
      %184 = vector.broadcast %183 : vector<1x128xf32> to vector<2x128xf32>
      %185 = arith.addf %182, %184 : vector<2x128xf32>
      %c0_62 = arith.constant 0 : index
      %c0_63 = arith.constant 0 : index
      %186 = vector.load %arg11[%c0_62, %c0_63] : memref<2x128xf32, #tpu.memory_space<vmem>>, vector<2x128xf32>
      tpu.vector_store %arg11[%c0_62, %c0_63], %185 {strides = array<i32>} : memref<2x128xf32, #tpu.memory_space<vmem>>, vector<2x128xf32>,
    } else {
    }
    return
  }
  func.func @transform_0(%arg0: i32) -> (i32, i32) {
    %c0_i32 = arith.constant 0 : i32
    %c0_i32_0 = arith.constant 0 : i32
    %c0_i32_1 = arith.constant 0 : i32
    return %c0_i32, %c0_i32_0 : i32, i32
  }
  func.func @transform_1(%arg0: i32) -> (i32, i32, i32) {
    %c0_i32 = arith.constant 0 : i32
    %c0_i32_0 = arith.constant 0 : i32
    %c0_i32_1 = arith.constant 0 : i32
    return %arg0, %c0_i32, %c0_i32_0 : i32, i32, i32
  }
  func.func @transform_2(%arg0: i32) -> (i32, i32, i32) {
    %c0_i32 = arith.constant 0 : i32
    %c0_i32_0 = arith.constant 0 : i32
    %c0_i32_1 = arith.constant 0 : i32
    return %arg0, %c0_i32, %c0_i32_0 : i32, i32, i32
  }
  func.func @transform_3(%arg0: i32) -> (i32, i32, i32) {
    %c0_i32 = arith.constant 0 : i32
    %c0_i32_0 = arith.constant 0 : i32
    %c0_i32_1 = arith.constant 0 : i32
    return %arg0, %c0_i32, %c0_i32_0 : i32, i32, i32
  }
  func.func @transform_4(%arg0: i32) -> (i32, i32, i32) {
    %c0_i32 = arith.constant 0 : i32
    %c0_i32_0 = arith.constant 0 : i32
    %c0_i32_1 = arith.constant 0 : i32
    return %arg0, %c0_i32, %c0_i32_0 : i32, i32, i32
  }
  func.func @transform_5(%arg0: i32) -> (i32, i32, i32) {
    %c0_i32 = arith.constant 0 : i32
    %c0_i32_0 = arith.constant 0 : i32
    %c0_i32_1 = arith.constant 0 : i32
    return %arg0, %c0_i32, %c0_i32_0 : i32, i32, i32
  }
  func.func @transform_6(%arg0: i32) -> (i32, i32, i32) {
    %c0_i32 = arith.constant 0 : i32
    %c0_i32_0 = arith.constant 0 : i32
    %c0_i32_1 = arith.constant 0 : i32
    return %arg0, %c0_i32, %c0_i32_0 : i32, i32, i32
  }
  func.func @transform_7(%arg0: i32) -> (i32, i32, i32) {
    %c0_i32 = arith.constant 0 : i32
    %c0_i32_0 = arith.constant 0 : i32
    %c0_i32_1 = arith.constant 0 : i32
    return %arg0, %c0_i32, %c0_i32_0 : i32, i32, i32
  }
  func.func @transform_8(%arg0: i32) -> (i32, i32) {
    %c0_i32 = arith.constant 0 : i32
    %c0_i32_0 = arith.constant 0 : i32
    %c0_i32_1 = arith.constant 0 : i32
    return %c0_i32, %c0_i32_0 : i32, i32
  }
  func.func @transform_9(%arg0: i32) -> (i32, i32) {
    %c0_i32 = arith.constant 0 : i32
    %c0_i32_0 = arith.constant 0 : i32
    %c0_i32_1 = arith.constant 0 : i32
    return %c0_i32, %c0_i32_0 : i32, i32
  }
  func.func @transform_10(%arg0: i32) -> (i32, i32) {
    %c0_i32 = arith.constant 0 : i32
    %c0_i32_0 = arith.constant 0 : i32
    %c0_i32_1 = arith.constant 0 : i32
    return %c0_i32, %c0_i32_0 : i32, i32
  }
}

</mosaic_0001>

<bundles_post_ra>
// kernel: tpu_custom_call.1
= control target key start
LH: loop header
LB: loop body
LE: loop exit
PB: predicated region body
PF: predicated region fallthrough
CT: control target
= control target key end

     0   :  { %s3983_s0 = inlined_call_operand.hbm [shape: f32[16,64], index: 0, kind: input, shape index: {}]   ;;  %s3984_s1 = inlined_call_operand.vmem [shape: bf16[2,64,192], index: 1, kind: input, shape index: {}]   ;;  %s3985_s2 = inlined_call_operand.hbm [shape: f32[2,1,192], index: 2, kind: input, shape index: {}]   ;;  %s3986_s3 = inlined_call_operand.vmem [shape: bf16[2,64,64], index: 3, kind: input, shape index: {}]   ;;  %s3987_s4 = inlined_call_operand.hbm [shape: f32[2,8,64], index: 4, kind: input, shape index: {}]   ;;  %s3988_s5 = inlined_call_operand.hbm [shape: bf16[2,64,128], index: 5, kind: input, shape index: {}]   ;;  %s3989_s6 = inlined_call_operand.vmem [shape: f32[2,1,128], index: 6, kind: input, shape index: {}]   ;;  %s3990_s7 = inlined_call_operand.vmem [shape: bf16[2,128,64], index: 7, kind: input, shape index: {}]   ;;  %s3991_s8 = inlined_call_operand.hbm [shape: bf16[64,128], index: 8, kind: input, shape index: {}]   ;;  %s3992_s9 = inlined_call_operand.vmem [shape: f32[1,128], index: 9, kind: input, shape index: {}]   ;;  %s3993_s10 = inlined_call_operand.hbm [shape: f32[2,128], index: 10, kind: output, shape index: {}]  }
   0x1   :  { %4006 = sst [smem:[#allocation21_spill]] %s3985_s2 }
   0x2   :  { %4007 = sst [smem:[#allocation22_spill]] %s3989_s6 }
   0x3   :  { %4008 = sst [smem:[#allocation23_spill]] %s3990_s7 }
   0x4   :  { %4009 = sst [smem:[#allocation24_spill]] %s3991_s8 }
   0x5   :  { %4010 = sst [smem:[#allocation25_spill]] %s3992_s9 }
   0x6   :  { %4011 = sst [smem:[#allocation26_spill]] %s3993_s10 }
   0x7   :  { %15 = vsyncpa [#allocation4], 0 }
   0x8   :  { %16 = vsyncpa [#allocation7], 0 }
   0x9   :  { %18 = vsyncpa [#allocation7 + $0x1], 0 }
   0xa   :  { %19 = vsyncpa [#allocation10], 0 }
   0xb   :  { %21 = vsyncpa [#allocation10 + $0x1], 0 }
   0xc   :  { %22 = vsyncpa [#allocation5], 0  ;;  %s3472_s13 = smov 0   ;;  %s3474_s14 = smov 0  }
   0xd   :  { %s3476_s15 = smov 0   ;;  %s3478_s16 = smov 0  }
   0xe LB: > { %4012 = sst [smem:[#allocation18_spill]] %s3389_s15  ;;  %s3491_s17 = sadd.s32 4294967295, %s3393_s16   ;;  %s3393_s16 = sphi %s3478_s16, %s4039_s16   ;;  %s3389_s15 = sphi %s3476_s15, %s4041_s15   ;;  %s3385_s14 = sphi %s3474_s14, %s4043_s14   ;;  %s3381_s13 = sphi %s3472_s13, %s4042_s13  }
   0xf   : > { %p95_p0 = scmp.ne.s32.totalorder %s3385_s14, %s3381_s13  ;;  %p3999_p1 = scmp.eq.s32.totalorder %s3491_s17, 0 }
  0x10   : > { %p2706_p2 = scmp.ge.s32.totalorder %s3393_s16, 1  ;;  %p299_p3 = scmp.lt.s32.totalorder %s3393_s16, 3 }
  0x11   : > { %p3500_p5 = por %p3999_p1, %p95_p0  ;;  %s3395_s20 = smov [#allocation11]  }
  0x12   : > { %p3504_p6 = pnand %p2706_p2, %p299_p3  ;;  %s324_s21 = sshll.u32 %s3395_s20, 4  ;;  %s325_s21 = int_to_ptr.vmem [resolvable:$true] %s324_s21 }
  0x13   : > { %s4013_s18 = scalar_select %p3500_p5, 1, 0 }
  0x14   : > { %s4014_s19 = scalar_select %p3504_p6, 1, 0 }
  0x15   : > { %p3021_p7 = pneg %p3504_p6  ;;  %s3517_s23 = sadd.s32 1, %s3393_s16  }
  0x16   : > { %4016 = sst [smem:[#allocation19_spill]] %s3517_s23  ;;  %s82_s24 = sadd.s32 1, %s3389_s15 }
  0x17   : > { %p3512_p8 = pnand %p3021_p7, %p3999_p1  ;;  %s79_s25 = ssub.s32 %s3393_s16, %s3517_s23 }
  0x18   : > { %s3194_s26 = scalar_lea.vmem %s325_s21, 512  ;;  %p3202_p13 = scmp.lt.s32.totalorder %s325_s21, %s325_s21 }
  0x19   : > { %s4015_s22 = scalar_select %p3512_p8, 1, 0 }
  0x1a   : > { %p4000_p9 = pneg %p3512_p8  ;;  %p3195_p10 = scmp.ne.s32.totalorder %s325_s21, %s3194_s26 }
  0x1b   : > { %p3203_p0 = scmp.lt.s32.totalorder %s3194_s26, %s3194_s26 }
  0x1c   : > { %p3197_p11 = pnand %p3195_p10, %p4000_p9 }
  0x1d   : > { %p3204_p2 = por %p3203_p0, %p3202_p13 }
  0x1e   : > { %p3198_p12 = pneg %p3197_p11 }
  0x20   : > { %p3205_p3 = pnand %p3204_p2, %p3198_p12 }
  0x22   : > { %3208 = shalt.err (!%p3205_p3)
}
  0x23   : > { %s3996_s27 = smov 64   ;;  %s3997_s28 = smov 4  }
  0x24   : > { %s4017_s8 = sld [smem:[#allocation24_spill]]  ;;  %p80_p7 = scmp.eq.s32.totalorder %s79_s25, 0 }
  0x25   : > { %p89_p10 = scmp.ne.s32.totalorder %s3389_s15, %s3385_s14  ;;  %p90_p11 = scmp.eq.s32.totalorder %s3393_s16, 0 }
  0x26   : > { %p3040_p12 = scmp.lt.s32.totalorder %s3393_s16, 2  ;;  %s3998_s12 = sand.u32 1, %s3393_s16  }
  0x27   : > { %s3540_s11 = scalar_select %p80_p7, %s3389_s15, %s82_s24  }
  0x28   : > { %p91_p13 = por %p90_p11, %p89_p10  ;;  %s3544_s13 = sand.u32 1, %s3389_s15  }
  0x29   : > { %4018 = sst [smem:[#allocation20_spill]] %s3540_s11  ;;  %s2710_s20 = sshll.u32 %s3544_s13, 1 }
  0x2a   : > { %3027 = dma.hbm_to_vmem [thread:$0]  (!%p3512_p8), %s4017_s8, 512, %s325_s21, [#allocation10], %s3996_s27, %s3996_s27, %s3997_s28  }
  0x2b   : > { %s2796_s26 = sshll.u32 %s3393_s16, 5  ;;  %s4019_s2 = sld [smem:[#allocation21_spill]] }
  0x2c   : > { %s353_s21 = scalar_lea.vmem [#allocation6], %s2710_s20  ;;  %p3553_p0 = pnand %p3040_p12, %p91_p13 }
  0x2d   : > { %s361_s25 = sshll.u32 %s353_s21, 4  ;;  %s2715_s30 = sshll.u32 %s3544_s13, 5  ;;  %s362_s25 = int_to_ptr.vmem [resolvable:$true] %s361_s25 }
  0x2e   : > { %s3560_s27 = scalar_lea.sflag [#allocation7], %s3998_s12  ;;  %p3566_p3 = pneg %p3553_p0 }
  0x31   : > { %s3551_s29 = scalar_lea.hbm %s4019_s2, %s2796_s26  ;;  %s3214_s26 = scalar_lea.hbm %s4019_s2, 64 }
  0x32   : > { %s3209_s28 = scalar_lea.hbm %s3551_s29, 32  ;;  %p3215_p11 = scmp.lt.s32.totalorder %s3551_s29, %s4019_s2 }
  0x33   : > { %p3210_p2 = scmp.ne.s32.totalorder %s3551_s29, %s3209_s28  ;;  %p3216_p12 = scmp.lt.s32.totalorder %s3214_s26, %s3209_s28 }
  0x35   : > { %p3212_p7 = pnand %p3566_p3, %p3210_p2  ;;  %p3217_p13 = por %p3216_p12, %p3215_p11 }
  0x37   : > { %p3213_p10 = pneg %p3212_p7 }
  0x39   : > { %p3218_p4 = pnand %p3217_p13, %p3213_p10 }
  0x3b   : > { %3221 = shalt.err (!%p3218_p4)
}
  0x3c   : > { %s3222_s12 = scalar_lea.vmem %s362_s25, 32  ;;  %s3398_s11 = smov [#allocation6]  }
  0x3d   : > { %p3223_p1 = scmp.ne.s32.totalorder %s362_s25, %s3222_s12  ;;  %s3227_s15 = sshll.u32 %s3398_s11, 4  ;;  %s3228_s15 = int_to_ptr.vmem [resolvable:$false] %s3227_s15 }
  0x3e   : > { %s3229_s9 = scalar_lea.vmem %s3228_s15, 64  ;;  %p3230_p2 = scmp.lt.s32.totalorder %s362_s25, %s3228_s15 }
  0x3f   : > { %p3225_p9 = pnand %p3223_p1, %p3566_p3  ;;  %p3231_p7 = scmp.lt.s32.totalorder %s3229_s9, %s3222_s12 }
  0x41   : > { %p3226_p5 = pneg %p3225_p9  ;;  %p3232_p6 = por %p3231_p7, %p3230_p2 }
  0x43   : > { %p3233_p8 = pnand %p3232_p6, %p3226_p5 }
  0x45   : > { %3236 = shalt.err (!%p3233_p8)
}
  0x46   : > { %3031 = dma.hbm_to_vmem [thread:$0]  (!%p3553_p0), %s3551_s29, 32, %s362_s25, %s3560_s27  }
  0x47   : > { %s398_s8 = scalar_lea.vmem [#allocation9], %s2715_s30  ;;  %s3399_s23 = smov [#allocation3]  }
  0x48   : > { %s405_s28 = sshll.u32 %s398_s8, 4  ;;  %s311_s20 = sshll.u32 %s3399_s23, 4  ;;  %s3585_s28 = int_to_ptr.vmem [resolvable:$true] %s405_s28  ;;  %s312_s20 = int_to_ptr.vmem [resolvable:$true] %s311_s20 }
  0x49   : > { %s3248_s11 = scalar_lea.vmem %s312_s20, 256  ;;  %p4022_p4 = scmp.ne.s32.totalorder %s4015_s22, 0 }
  0x4a   : > { %p3249_p1 = scmp.ne.s32.totalorder %s312_s20, %s3248_s11  ;;  %p3256_p6 = scmp.lt.s32.totalorder %s312_s20, %s312_s20 }
  0x4b   : > { %p4023_p9 = pneg %p4022_p4  ;;  %p3257_p8 = scmp.lt.s32.totalorder %s3248_s11, %s3248_s11 }
  0x4d   : > { %p3251_p10 = pnand %p3249_p1, %p4023_p9  ;;  %p3258_p11 = por %p3257_p8, %p3256_p6 }
  0x4f   : > { %p3252_p5 = pneg %p3251_p10 }
  0x51   : > { %p3259_p12 = pnand %p3258_p11, %p3252_p5 }
  0x53   : > { %3262 = shalt.err (!%p3259_p12)
}
  0x54   : > { %s3400_s9 = smov 128   ;;  %s3401_s15 = smov 8  }
  0x55   : > { %3024 = dma.hbm_to_vmem [thread:$0]  (!%p4022_p4), %s3983_s0, 256, %s312_s20, [#allocation4], %s3400_s9, %s3400_s9, %s3401_s15  }
  0x56   : > { %s2713_s25 = sshll.u32 %s3544_s13, 3  ;;  %s2714_s30 = sshll.u32 %s3393_s16, 7 }
  0x57   : > { %s3600_s8 = scalar_lea.hbm %s3987_s4, %s2714_s30  ;;  %s380_s23 = scalar_lea.vmem [#allocation8], %s2713_s25 }
  0x58   : > { %s387_s11 = sshll.u32 %s380_s23, 4  ;;  %s2797_s2 = sshll.u32 %s3393_s16, 9  ;;  %s388_s11 = int_to_ptr.vmem [resolvable:$true] %s387_s11 }
  0x59   : > { %s3606_s6 = scalar_lea.hbm %s3988_s5, %s2797_s2  ;;  %s3263_s20 = scalar_lea.hbm %s3600_s8, 128 }
  0x5a   : > { %p3264_p13 = scmp.ne.s32.totalorder %s3600_s8, %s3263_s20  ;;  %s3268_s15 = scalar_lea.hbm %s3987_s4, 256 }
  0x5b   : > { %p3269_p1 = scmp.lt.s32.totalorder %s3600_s8, %s3987_s4  ;;  %p3270_p4 = scmp.lt.s32.totalorder %s3268_s15, %s3263_s20 }
  0x5c   : > { %p3266_p2 = pnand %p3264_p13, %p3566_p3 }
  0x5d   : > { %p3271_p9 = por %p3270_p4, %p3269_p1 }
  0x5e   : > { %p3267_p7 = pneg %p3266_p2 }
  0x60   : > { %p3272_p10 = pnand %p3271_p9, %p3267_p7 }
  0x62   : > { %3275 = shalt.err (!%p3272_p10)
}
  0x63   : > { %s3276_s7 = scalar_lea.vmem %s388_s11, 128  ;;  %s3402_s2 = smov [#allocation8]  }
  0x64   : > { %p3277_p5 = scmp.ne.s32.totalorder %s388_s11, %s3276_s7  ;;  %s3281_s25 = sshll.u32 %s3402_s2, 4  ;;  %s3282_s25 = int_to_ptr.vmem [resolvable:$false] %s3281_s25 }
  0x65   : > { %s3283_s30 = scalar_lea.vmem %s3282_s25, 256  ;;  %p3284_p11 = scmp.lt.s32.totalorder %s388_s11, %s3282_s25 }
  0x66   : > { %p3279_p6 = pnand %p3277_p5, %p3566_p3  ;;  %p3285_p12 = scmp.lt.s32.totalorder %s3283_s30, %s3276_s7 }
  0x68   : > { %p3280_p8 = pneg %p3279_p6  ;;  %p3286_p13 = por %p3285_p12, %p3284_p11 }
  0x6a   : > { %p3287_p2 = pnand %p3286_p13, %p3280_p8 }
  0x6c   : > { %3290 = shalt.err (!%p3287_p2)
}
  0x6d   : > { %3034 = dma.hbm_to_vmem [thread:$0]  (!%p3553_p0), %s3600_s8, 128, %s388_s11, %s3560_s27  }
  0x6e   : > { %s4024_s26 = sand.u32 1, %s3393_s16   ;;  %s3291_s23 = scalar_lea.hbm %s3606_s6, 512 }
  0x6f   : > { %s395_s21 = scalar_lea.sflag [#allocation10], %s4024_s26  ;;  %p3292_p7 = scmp.ne.s32.totalorder %s3606_s6, %s3291_s23 }
  0x70   : > { %s3296_s13 = scalar_lea.hbm %s3988_s5, 1024  ;;  %p3297_p9 = scmp.lt.s32.totalorder %s3606_s6, %s3988_s5 }
  0x71   : > { %p3294_p1 = pnand %p3292_p7, %p3566_p3  ;;  %p3298_p10 = scmp.lt.s32.totalorder %s3296_s13, %s3291_s23 }
  0x73   : > { %p3295_p4 = pneg %p3294_p1  ;;  %p3299_p5 = por %p3298_p10, %p3297_p9 }
  0x75   : > { %p3300_p6 = pnand %p3299_p5, %p3295_p4 }
  0x77   : > { %3303 = shalt.err (!%p3300_p6)
}
  0x78   : > { %s3304_s16 = scalar_lea.vmem %s3585_s28, 512  ;;  %s3403_s27 = smov [#allocation9]  }
  0x79   : > { %p3305_p8 = scmp.ne.s32.totalorder %s3585_s28, %s3304_s16  ;;  %s3309_s8 = sshll.u32 %s3403_s27, 4  ;;  %s3310_s8 = int_to_ptr.vmem [resolvable:$false] %s3309_s8 }
  0x7a   : > { %s3311_s11 = scalar_lea.vmem %s3310_s8, 1024  ;;  %p3312_p13 = scmp.lt.s32.totalorder %s3585_s28, %s3310_s8 }
  0x7b   : > { %p3307_p11 = pnand %p3305_p8, %p3566_p3  ;;  %p3313_p2 = scmp.lt.s32.totalorder %s3311_s11, %s3304_s16 }
  0x7d   : > { %p3308_p12 = pneg %p3307_p11  ;;  %p3314_p7 = por %p3313_p2, %p3312_p13 }
  0x7f   : > { %p3315_p1 = pnand %p3314_p7, %p3308_p12 }
  0x81   : > { %3318 = shalt.err (!%p3315_p1)
}
  0x82   : > { %s4025_s12 = smov 4   ;;  %s4026_s29 = smov 64  }
  0x83   : > { %3037 = dma.hbm_to_vmem [thread:$0]  (!%p3553_p0), %s3606_s6, 512, %s3585_s28, %s395_s21, %s4026_s29, %s4026_s29, %s4025_s12  }
  0x84   : > { %p4027_p3 = scmp.ne.s32.totalorder %s4014_s19, 0 }
  0x85   : > { %p4028_p4 = scmp.eq.s32.totalorder (!%p4027_p3), %s3491_s17, 0 }
  0x86   : > { %431 = sbr.rel (%p4027_p3) target bundleno = 4573 (0x11dd), region = 60 }
  0x8b   : > { %3360 = dma.done.wait (%p4028_p4), [#allocation4], 256   ;;  %p4029_p9 = pmov %p4028_p4 }
  0x8c   : > { %s437_s10 = sand.u32 1, %s3491_s17   ;;  %s439_s24 = sand.u32 1, %s3385_s14  }
  0x8d   : > { %3362 = vsyncadd (%p4029_p9), [#allocation4], 4294967040  ;;  %s2720_s7 = sshll.u32 %s439_s24, 1  ;;  %s438_s2 = scalar_lea.sflag [#allocation7], %s437_s10 }
  0x8e   : > { %s3658_s25 = scalar_lea.vmem [#allocation6], %s2720_s7  ;;  %p4030_p10 = scmp.ne.s32.totalorder %s4013_s18, 0 }
  0x90   : > { %3364 = dma.done.wait (%p4030_p10), %s438_s2, 160  }
  0x91   : > { %3366 = vsyncadd (%p4030_p10), %s438_s2, 4294967136  ;;  %s2721_s6 = sshll.u32 %s439_s24, 3  ;;  %s2722_s19 = sshll.u32 %s439_s24, 5 }
  0x92   : > { %s3664_s28 = scalar_lea.vmem [#allocation8], %s2721_s6  ;;  %s456_s30 = scalar_lea.sflag [#allocation10], %s437_s10 }
  0x93   : > { %s3666_s26 = scalar_lea.vmem [#allocation9], %s2722_s19 }
  0x94   : > { %3368 = dma.done.wait (%p4030_p10), %s456_s30, 512  }
  0x95   : > { %3370 = vsyncadd (%p4030_p10), %s456_s30, 4294966784  ;;  %p4031_p0 = pmov %p4028_p4 }
  0x97   : > { %3372 = dma.done.wait (%p4031_p0), [#allocation10], 512   ;;  %p4032_p5 = pmov %p4031_p0 }
  0x98   : > { %p523_p6 = scmp.lt.s32.totalorder %s3491_s17, 1  ;;  %s4033_s11 = sld [smem:[#allocation22_spill]] }
  0x99   : > { %3374 = vsyncadd (%p4032_p5), [#allocation10], 4294966784  ;;  %s4034_s24 = sld [smem:[#allocation23_spill]]  ;;  %p4035_p8 = scmp.ne.s32.totalorder %s3491_s17, 0 }
  0x9a   : > { %s3678_s21 = scalar_select %p523_p6, %s3491_s17, 1 }
  0x9b   : > { %545 = sbr.rel (%p4035_p8) target bundleno = 162 (0xa2), region = 84 }
  0x9c   : > { %s2798_s23 = sshll.u32 %s3678_s21, 6  ;;  %s2799_s22 = sshll.u32 %s3678_s21, 5 }
  0x9d   : > { %s527_s18 = scalar_lea.vmem %s3984_s1, %s2798_s23  ;;  %s3688_s16 = scalar_lea.vmem %s3986_s3, %s2799_s22 }
  0x9e   : > { %s535_s12 = scalar_lea.vmem %s4033_s11, %s3678_s21 }
  0x9f   : > { %s3697_s7 = scalar_lea.vmem %s4034_s24, %s2798_s23 }
  0xa0   : > { %v546_v0 = vld [vmem:[#allocation3] sm:$0xff]  ;;  %vm548_vm0 = vcmask 523264   ;;  %v547_v1 = vld [vmem:[#allocation3 + $0x8] sm:$0xff] }
  0xa1   : > { %549 = vst.msk [vmem:[#allocation2] sm:$0xff] %vm548_vm0, %v546_v0  ;;  %550 = vst.msk [vmem:[#allocation2 + $0x8] sm:$0xff] %vm548_vm0, %v547_v1 }
  0xa2 PF: > { %v3111_v2 = vld [vmem:[%s527_s18 + $0x34] ss:$8 sps:$4 sm:$0xff]   ;;  %v3113_v3 = vld [vmem:[%s527_s18 + $0x30] ss:$8 sps:$4 sm:$0xff]   ;;  %v3404_v4 = vmov 0   ;;  %vm615_vm1 = vcmask 523264   ;;  %v565_v15 = vlaneseq }
  0xa3   : > { %651 = vmatprep.mubr.bf16.mxu0 %v3404_v4  ;;  %627 = vmatprep.subr.bf16.mxu0 %v3111_v2  ;;  %v3114_v5 = vld [vmem:[%s527_s18 + $0x24] ss:$8 sps:$4 sm:$0xff]   ;;  %v3116_v6 = vld [vmem:[%s527_s18 + $0x20] ss:$8 sps:$4 sm:$0xff]   ;;  %v3117_v7 = vld [vmem:[%s527_s18 + $0x14] ss:$8 sps:$4 sm:$0xff]  }
  0xa4   : > { %628 = vmatpush1.bf16.msra.mxu0 %v3113_v3  ;;  %v3119_v8 = vld [vmem:[%s527_s18 + $0x10] ss:$8 sps:$4 sm:$0xff]   ;;  %v3120_v9 = vld [vmem:[%s527_s18 + $0x4] ss:$8 sps:$4 sm:$0xff]   ;;  %v3122_v10 = vld [vmem:[%s527_s18] ss:$8 sps:$4 sm:$0xff]  }
  0xa5   : > { %629 = vmatprep.subr.bf16.mxu0 %v3114_v5  ;;  %v3405_v14 = vmov 0.0   ;;  %v3711_v16 = vshrl.u32 %v565_v15, 7  ;;  %vm3406_vm2 = vmmov 0   ;;  %v563_v18 = vld [vmem:[%s3658_s25] sm:$0x3]  ;;  %s3407_s2 = smov 64  }
  0xa6   : > { %2860 = vmatprep.subr.mxu1 %v3405_v14  ;;  %2862 = vmatprep.mubr.msk.f32.mxu1 %vm3406_vm2, %v3405_v14  ;;  %vm665_vm3 = vcmask 130048   ;;  %vm817_vm4 = vcmask 64512   ;;  %s3408_s25 = smov 48   ;;  %s3409_s6 = smov 112   ;;  %vm2004_vm5 = vcmask 261120   ;;  %vm2007_vm6 = vcmask 392192  }
  0xa7   : > { %v567_v17 = vsub.s32 0, %v3711_v16  ;;  %v571_v25 = vsub.s32 1, %v3711_v16  ;;  %s3410_s19 = smov 32   ;;  %s3411_s30 = smov 96  }
  0xa8   : > { %630 = vmatpush1.bf16.msra.mxu0 %v3116_v6  ;;  %v3701_v11 = vld [vmem:[#allocation2] sm:$0xff]  ;;  %v3703_v12 = vld [vmem:[#allocation2 + $0x8] sm:$0xff]  ;;  %s3412_s23 = smov 16   ;;  %s3413_s22 = smov 80  }
  0xa9   : > { %631 = vmatprep.subr.bf16.mxu0 %v3117_v7  ;;  %v554_v13 = vpack.c.bf16 %v3703_v12, %v3701_v11  ;;  %v568_v19 = vrot.slane %v563_v18, %v567_v17  ;;  %v572_v27 = vrot.slane %v563_v18, %v571_v25  ;;  %p2783_p11 = scmp.ne.s32.totalorder %s3491_s17, 1 }
  0xaa   : > { %s4037_s18 = sld [smem:[#allocation25_spill]] (!%p2783_p11) }
  0xac   : > { %632 = vmatpush1.bf16.msra.mxu0 %v3119_v8 }
  0xad   : > { %633 = vmatprep.subr.bf16.mxu0 %v3120_v9 }
  0xb0   : > { %634 = vmatpush1.bf16.msra.mxu0 %v3122_v10 }
  0xb1   : > { %2885 = vmatprep.subr.mxu0 %v3405_v14 }
  0xb3   : > { %2739 = vmatmul.mubr.msk.bf16.vlgmr.msra.gmra.mxu0 %vm615_vm1, %v554_v13 }
  0xb4   : > { %2887 = vmatprep.mubr.msk.f32.mxu0 %vm3406_vm2, %v3405_v14 }
 0x173   : > { %v653_v20 = vpop.f32.mrf.mxu0 }
 0x174   : > { %v3721_v21 = vadd.f32 %v653_v20, %v568_v19 }
 0x175   : > { %v655_v22 = vpop.f32.mrf.mxu0 }
 0x176   : > { %663 = vrot.lane.b32.xlu0 %v3721_v21, %s3407_s2  ;;  %v3738_v29 = vadd.f32 %v655_v22, %v572_v27 }
 0x177   : > { %v657_v23 = vpop.f32.mrf.mxu0 }
 0x178   : > { %v3724_v24 = vadd.f32 %v657_v23, %v568_v19 }
 0x179   : > { %v659_v52 = vpop.f32.mrf.mxu0 }
 0x17a   : > { %741 = vrot.lane.b32.xlu0 %v3724_v24, %s3407_s2  ;;  %v3763_v55 = vadd.f32 %v659_v52, %v572_v27 }
 0x1e8   : > { %v664_v26 = vpop.permute.xlu0 %663 }
 0x1e9   : > { %2861 = vmatpush3.xpose.msk.msra.mxu1 %vm665_vm3, %v664_v26 }
 0x1ea   : > { %2865 = vmatprep.subr.mxu1 %v3405_v14 }
 0x1ec   : > { %2863 = vmatmul.mubr.msk.f32.vlgmr.msra.gmra.mxu1 %vm665_vm3, %v3721_v21  ;;  %v742_v28 = vpop.permute.xlu0 %741 }
 0x1ed   : > { %2866 = vmatpush3.xpose.msk.msra.mxu1 %vm665_vm3, %v742_v28  ;;  %2867 = vmatprep.mubr.msk.f32.mxu1 %vm3406_vm2, %v3405_v14 }
 0x1ee   : > { %2870 = vmatprep.subr.mxu1 %v3405_v14 }
 0x1f0   : > { %2868 = vmatmul.mubr.msk.f32.vlgmr.msra.gmra.mxu1 %vm665_vm3, %v3724_v24 }
 0x1f1   : > { %2871 = vmatpush3.msra.mxu1 %v3738_v29  ;;  %2872 = vmatprep.mubr.msk.f32.mxu1 %vm3406_vm2, %v3405_v14 }
 0x1f2   : > { %2875 = vmatprep.subr.mxu1 %v3405_v14 }
 0x2ac   : > { %v736_v30 = vpop.f32.mrf.mxu1 }
 0x2ad   : > { %v818_v31 = vsel %vm817_vm4, %v736_v30, -inf }
 0x2ae   : > { %819 = vmax.xlane.f32.xlu1 %v818_v31  ;;  %v2864_v32 = vpop.f32.mrf.mxu1 }
 0x2b0   : > { %v813_v33 = vpop.f32.mrf.mxu1 }
 0x2b1   : > { %v821_v34 = vsel %vm817_vm4, %v813_v33, -inf }
 0x2b2   : > { %822 = vmax.xlane.f32.xlu1 %v821_v34  ;;  %v2869_v35 = vpop.f32.mrf.mxu1 }
 0x2c3   : > { %988 = vrot.lane.b32.xlu1 %v3721_v21, %s3408_s25 }
 0x2c7   : > { %1066 = vrot.lane.b32.xlu1 %v3724_v24, %s3408_s25 }
 0x2cb   : > { %986 = vrot.lane.b32.xlu1 %v3721_v21, %s3409_s6 }
 0x337   : > { %v820_v36 = vpop.xlane.xlu1 %819 }
 0x338   : > { %v824_v37 = vsub.f32 %v736_v30, %v820_v36 }
 0x33a   : > { %v826_v38 = vmul.f32 1.442695, %v824_v37 }
 0x33b   : > { %v823_v39 = vpop.xlane.xlu1 %822 }
 0x33c   : > { %3139 = vpow2.f32 %v826_v38  ;;  %v825_v40 = vsub.f32 %v813_v33, %v823_v39 }
 0x33e   : > { %v828_v41 = vmul.f32 1.442695, %v825_v40 }
 0x33f   : > { %v989_v42 = vpop.permute.xlu1 %988 }
 0x340   : > { %3141 = vpow2.f32 %v828_v41 }
 0x343   : > { %v1067_v43 = vpop.permute.xlu1 %1066 }
 0x344   : > { %2886 = vmatpush3.xpose.msk.msra.mxu0 %vm665_vm3, %v1067_v43 }
 0x345   : > { %2895 = vmatprep.subr.mxu0 %v3405_v14 }
 0x347   : > { %v987_v48 = vpop.permute.xlu1 %986 }
 0x349   : > { %v3140_v44 = vpop.eup %3139 }
 0x34a   : > { %v830_v45 = vsel %vm817_vm4, %v3140_v44, 0.0 }
 0x34b   : > { %831 = vadd.xlane.f32.xlu0 %v830_v45 }
 0x34d   : > { %v3142_v46 = vpop.eup %3141 }
 0x34e   : > { %v833_v47 = vsel %vm817_vm4, %v3142_v46, 0.0 }
 0x34f   : > { %834 = vadd.xlane.f32.xlu1 %v833_v47 }
 0x360   : > { %1064 = vrot.lane.b32.xlu1 %v3724_v24, %s3409_s6 }
 0x3d4   : > { %v832_v49 = vpop.xlane.xlu0 %831 }
 0x3d5   : > { %3143 = vrcp.f32 %v832_v49 }
 0x3d8   : > { %v835_v50 = vpop.xlane.xlu1 %834 }
 0x3d9   : > { %3145 = vrcp.f32 %v835_v50 }
 0x3dc   : > { %v1065_v51 = vpop.permute.xlu1 %1064 }
 0x3dd   : > { %2888 = vmatmul.mubr.msk.f32.vlgmr.msra.gmra.mxu0 %vm665_vm3, %v1065_v51 }
 0x3de   : > { %2897 = vmatprep.mubr.msk.f32.mxu0 %vm3406_vm2, %v3405_v14 }
 0x3e2   : > { %v3144_v53 = vpop.eup %3143 }
 0x3e3   : > { %v838_v54 = vmul.f32 %v3144_v53, %v3140_v44 }
 0x3e5   : > { %2873 = vmatmul.mubr.msk.f32.vlgmr.msra.gmra.mxu1 %vm817_vm4, %v838_v54 }
 0x3e6   : > { %v3146_v56 = vpop.eup %3145  ;;  %2876 = vmatpush3.msra.mxu1 %v3763_v55  ;;  %2877 = vmatprep.mubr.msk.f32.mxu1 %vm3406_vm2, %v3405_v14 }
 0x3e7   : > { %2880 = vmatprep.subr.mxu1 %v3405_v14  ;;  %v839_v57 = vmul.f32 %v3146_v56, %v3142_v46 }
 0x3e9   : > { %2878 = vmatmul.mubr.msk.f32.vlgmr.msra.gmra.mxu1 %vm817_vm4, %v839_v57 }
 0x3ea   : > { %2881 = vmatpush3.xpose.msk.msra.mxu1 %vm665_vm3, %v989_v42  ;;  %2882 = vmatprep.mubr.msk.f32.mxu1 %vm3406_vm2, %v3405_v14 }
 0x3eb   : > { %2890 = vmatprep.subr.mxu1 %v3405_v14 }
 0x3ed   : > { %2883 = vmatmul.mubr.msk.f32.vlgmr.msra.gmra.mxu1 %vm665_vm3, %v987_v48 }
 0x3ee   : > { %2892 = vmatprep.mubr.msk.f32.mxu1 %vm3406_vm2, %v3405_v14 }
 0x49d   : > { %v1138_v58 = vpop.f32.mrf.mxu0 }
 0x49e   : > { %v1145_v59 = vsel %vm817_vm4, %v1138_v58, -inf }
 0x49f   : > { %1146 = vmax.xlane.f32.xlu1 %v1145_v59  ;;  %v2889_v60 = vpop.f32.mrf.mxu0 }
 0x4a5   : > { %v3779_v61 = vpop.f32.mrf.mxu1 }
 0x4a7   : > { %v2874_v62 = vpop.f32.mrf.mxu1 }
 0x4a9   : > { %v3781_v63 = vpop.f32.mrf.mxu1 }
 0x4ab   : > { %v2879_v0 = vpop.f32.mrf.mxu1 }
 0x4ad   : > { %v1060_v1 = vpop.f32.mrf.mxu1 }
 0x4ae   : > { %v1142_v2 = vsel %vm817_vm4, %v1060_v1, -inf }
 0x4af   : > { %1143 = vmax.xlane.f32.xlu0 %v1142_v2  ;;  %v2884_v3 = vpop.f32.mrf.mxu1 }
 0x4b0   : > { %1398 = vrot.lane.b32.xlu1 %v3724_v24, %s3410_s19 }
 0x528   : > { %v1147_v4 = vpop.xlane.xlu1 %1146 }
 0x529   : > { %v1149_v5 = vsub.f32 %v1138_v58, %v1147_v4 }
 0x52b   : > { %v1152_v6 = vmul.f32 1.442695, %v1149_v5 }
 0x52c   : > { %v1399_v28 = vpop.permute.xlu1 %1398 }
 0x52d   : > { %3147 = vpow2.f32 %v1152_v6 }
 0x538   : > { %v1144_v9 = vpop.xlane.xlu0 %1143 }
 0x539   : > { %v1148_v10 = vsub.f32 %v1060_v1, %v1144_v9 }
 0x53a   : > { %v3148_v7 = vpop.eup %3147 }
 0x53b   : > { %v1157_v8 = vsel %vm817_vm4, %v3148_v7, 0.0  ;;  %v1150_v13 = vmul.f32 1.442695, %v1148_v10 }
 0x53c   : > { %1158 = vadd.xlane.f32.xlu0 %v1157_v8 }
 0x53d   : > { %3149 = vpow2.f32 %v1150_v13 }
 0x54a   : > { %v3150_v18 = vpop.eup %3149 }
 0x54b   : > { %v1154_v19 = vsel %vm817_vm4, %v3150_v18, 0.0 }
 0x552   : > { %1165 = vrot.lane.b32.xlu0 %v3738_v29, %s3409_s6 }
 0x556   : > { %1242 = vrot.lane.b32.xlu0 %v3763_v55, %s3409_s6 }
 0x55a   : > { %1320 = vrot.lane.b32.xlu0 %v3721_v21, %s3410_s19 }
 0x579   : > { %1155 = vadd.xlane.f32.xlu0 %v1154_v19 }
 0x58f   : > { %1318 = vrot.lane.b32.xlu0 %v3721_v21, %s3411_s30 }
 0x593   : > { %1396 = vrot.lane.b32.xlu0 %v3724_v24, %s3411_s30 }
 0x5c5   : > { %v1159_v20 = vpop.xlane.xlu0 %1158 }
 0x5c6   : > { %3151 = vrcp.f32 %v1159_v20 }
 0x5c9   : > { %v1166_v22 = vpop.permute.xlu0 %1165 }
 0x5ca   : > { %2891 = vmatpush3.msra.mxu1 %v1166_v22 }
 0x5cb   : > { %2900 = vmatprep.subr.mxu1 %v3405_v14 }
 0x5cd   : > { %v1243_v23 = vpop.permute.xlu0 %1242 }
 0x5ce   : > { %2896 = vmatpush3.msra.mxu0 %v1243_v23 }
 0x5cf   : > { %2905 = vmatprep.subr.mxu0 %v3405_v14 }
 0x5d1   : > { %v1321_v30 = vpop.permute.xlu0 %1320 }
 0x5d3   : > { %v3152_v26 = vpop.eup %3151 }
 0x5d4   : > { %v1163_v27 = vmul.f32 %v3152_v26, %v3148_v7 }
 0x5d6   : > { %2898 = vmatmul.mubr.msk.f32.vlgmr.msra.gmra.mxu0 %vm817_vm4, %v1163_v27 }
 0x5d7   : > { %2906 = vmatpush3.xpose.msk.msra.mxu0 %vm665_vm3, %v1399_v28  ;;  %2907 = vmatprep.mubr.msk.f32.mxu0 %vm3406_vm2, %v3405_v14 }
 0x5d8   : > { %2915 = vmatprep.subr.mxu0 %v3405_v14 }
 0x602   : > { %v1156_v31 = vpop.xlane.xlu0 %1155 }
 0x603   : > { %3153 = vrcp.f32 %v1156_v31 }
 0x606   : > { %v1319_v32 = vpop.permute.xlu0 %1318 }
 0x60a   : > { %v1397_v33 = vpop.permute.xlu0 %1396 }
 0x60b   : > { %2908 = vmatmul.mubr.msk.f32.vlgmr.msra.gmra.mxu0 %vm665_vm3, %v1397_v33 }
 0x60c   : > { %2917 = vmatprep.mubr.msk.f32.mxu0 %vm3406_vm2, %v3405_v14 }
 0x610   : > { %v3154_v34 = vpop.eup %3153 }
 0x611   : > { %v1162_v35 = vmul.f32 %v3154_v34, %v3150_v18 }
 0x613   : > { %2893 = vmatmul.mubr.msk.f32.vlgmr.msra.gmra.mxu1 %vm817_vm4, %v1162_v35 }
 0x614   : > { %2901 = vmatpush3.xpose.msk.msra.mxu1 %vm665_vm3, %v1321_v30  ;;  %2902 = vmatprep.mubr.msk.f32.mxu1 %vm3406_vm2, %v3405_v14 }
 0x615   : > { %2910 = vmatprep.subr.mxu1 %v3405_v14 }
 0x617   : > { %2903 = vmatmul.mubr.msk.f32.vlgmr.msra.gmra.mxu1 %vm665_vm3, %v1319_v32 }
 0x618   : > { %2912 = vmatprep.mubr.msk.f32.mxu1 %vm3406_vm2, %v3405_v14 }
 0x696   : > { %v3816_v36 = vpop.f32.mrf.mxu0 }
 0x698   : > { %v2899_v37 = vpop.f32.mrf.mxu0 }
 0x6cb   : > { %v1470_v38 = vpop.f32.mrf.mxu0 }
 0x6cc   : > { %v1477_v39 = vsel %vm817_vm4, %v1470_v38, -inf }
 0x6cd   : > { %1478 = vmax.xlane.f32.xlu1 %v1477_v39  ;;  %v2909_v40 = vpop.f32.mrf.mxu0 }
 0x6d3   : > { %v3819_v41 = vpop.f32.mrf.mxu1 }
 0x6d4   : > { %v3096_v42 = vpack.i.bf16 %v3816_v36, %v3819_v41 }
 0x6d5   : > { %v2894_v43 = vpop.f32.mrf.mxu1 }
 0x6d7   : > { %v1392_v44 = vpop.f32.mrf.mxu1 }
 0x6d8   : > { %v1474_v45 = vsel %vm817_vm4, %v1392_v44, -inf }
 0x6d9   : > { %1475 = vmax.xlane.f32.xlu0 %v1474_v45  ;;  %v2904_v46 = vpop.f32.mrf.mxu1  ;;  %v3125_v45 = vld [vmem:[%s3688_s16 + $0x8] sm:$0xff]  }
 0x6de   : > { %1572 = vrot.lane.b32.xlu1 %v3763_v55, %s3411_s30 }
 0x6e2   : > { %1650 = vrot.lane.b32.xlu1 %v3721_v21, %s3412_s23 }
 0x6e6   : > { %1648 = vrot.lane.b32.xlu1 %v3721_v21, %s3413_s22 }
 0x756   : > { %v1479_v47 = vpop.xlane.xlu1 %1478 }
 0x757   : > { %v1481_v48 = vsub.f32 %v1470_v38, %v1479_v47 }
 0x759   : > { %v1484_v49 = vmul.f32 1.442695, %v1481_v48  ;;  %v3126_v48 = vld [vmem:[%s3688_s16] sm:$0xff]  }
 0x75a   : > { %v1573_v50 = vpop.permute.xlu1 %1572 }
 0x75b   : > { %3155 = vpow2.f32 %v1484_v49  ;;  %2916 = vmatpush3.msra.mxu0 %v1573_v50 }
 0x75c   : > { %2925 = vmatprep.subr.mxu0 %v3405_v14 }
 0x75e   : > { %v1651_v3 = vpop.permute.xlu1 %1650 }
 0x762   : > { %v1476_v53 = vpop.xlane.xlu0 %1475  ;;  %v1649_v5 = vpop.permute.xlu1 %1648 }
 0x763   : > { %v1480_v54 = vsub.f32 %v1392_v44, %v1476_v53  ;;  %v3124_v44 = vld [vmem:[%s3688_s16 + $0x10] sm:$0xff]  }
 0x765   : > { %v1482_v56 = vmul.f32 1.442695, %v1480_v54 }
 0x767   : > { %3157 = vpow2.f32 %v1482_v56 }
 0x768   : > { %v3156_v51 = vpop.eup %3155 }
 0x769   : > { %v1489_v52 = vsel %vm817_vm4, %v3156_v51, 0.0 }
 0x76a   : > { %1490 = vadd.xlane.f32.xlu0 %v1489_v52 }
 0x774   : > { %v3158_v21 = vpop.eup %3157 }
 0x775   : > { %v1486_v57 = vsel %vm817_vm4, %v3158_v21, 0.0 }
 0x780   : > { %1496 = vrot.lane.b32.xlu0 %v3738_v29, %s3411_s30 }
 0x79f   : > { %1487 = vadd.xlane.f32.xlu0 %v1486_v57 }
 0x7b5   : > { %1728 = vrot.lane.b32.xlu0 %v3724_v24, %s3412_s23 }
 0x7b9   : > { %1726 = vrot.lane.b32.xlu0 %v3724_v24, %s3413_s22 }
 0x7f3   : > { %v1491_v58 = vpop.xlane.xlu0 %1490 }
 0x7f4   : > { %3159 = vrcp.f32 %v1491_v58 }
 0x7f7   : > { %v1497_v59 = vpop.permute.xlu0 %1496 }
 0x7f8   : > { %2911 = vmatpush3.msra.mxu1 %v1497_v59 }
 0x7f9   : > { %2920 = vmatprep.subr.mxu1 %v3405_v14 }
 0x801   : > { %v3160_v60 = vpop.eup %3159 }
 0x802   : > { %v1495_v62 = vmul.f32 %v3160_v60, %v3156_v51 }
 0x804   : > { %2918 = vmatmul.mubr.msk.f32.vlgmr.msra.gmra.mxu0 %vm817_vm4, %v1495_v62 }
 0x805   : > { %2927 = vmatprep.mubr.msk.f32.mxu0 %vm3406_vm2, %v3405_v14 }
 0x828   : > { %v1488_v0 = vpop.xlane.xlu0 %1487 }
 0x829   : > { %3161 = vrcp.f32 %v1488_v0 }
 0x82c   : > { %v1729_v1 = vpop.permute.xlu0 %1728 }
 0x82d   : > { %2926 = vmatpush3.xpose.msk.msra.mxu0 %vm665_vm3, %v1729_v1 }
 0x82e   : > { %2935 = vmatprep.subr.mxu0 %v3405_v14 }
 0x830   : > { %v1727_v24 = vpop.permute.xlu0 %1726 }
 0x831   : > { %2928 = vmatmul.mubr.msk.f32.vlgmr.msra.gmra.mxu0 %vm665_vm3, %v1727_v24 }
 0x832   : > { %2937 = vmatprep.mubr.msk.f32.mxu0 %vm3406_vm2, %v3405_v14 }
 0x836   : > { %v3162_v2 = vpop.eup %3161 }
 0x837   : > { %v1494_v4 = vmul.f32 %v3162_v2, %v3158_v21 }
 0x839   : > { %2913 = vmatmul.mubr.msk.f32.vlgmr.msra.gmra.mxu1 %vm817_vm4, %v1494_v4 }
 0x83a   : > { %2921 = vmatpush3.xpose.msk.msra.mxu1 %vm665_vm3, %v1651_v3  ;;  %2922 = vmatprep.mubr.msk.f32.mxu1 %vm3406_vm2, %v3405_v14 }
 0x83b   : > { %2930 = vmatprep.subr.mxu1 %v3405_v14 }
 0x83d   : > { %2923 = vmatmul.mubr.msk.f32.vlgmr.msra.gmra.mxu1 %vm665_vm3, %v1649_v5  ;;  %v3894_v5 = vld [vmem:[%s3664_s28] sm:$0xff] }
 0x83e   : > { %2932 = vmatprep.mubr.msk.f32.mxu1 %vm3406_vm2, %v3405_v14 }
 0x8c4   : > { %v1644_v6 = vpop.f32.mrf.mxu0 }
 0x8c6   : > { %v2919_v7 = vpop.f32.mrf.mxu0 }
 0x8f1   : > { %v1800_v8 = vpop.f32.mrf.mxu0 }
 0x8f2   : > { %v1807_v9 = vsel %vm817_vm4, %v1800_v8, -inf }
 0x8f3   : > { %1808 = vmax.xlane.f32.xlu0 %v1807_v9  ;;  %v2929_v10 = vpop.f32.mrf.mxu0 }
 0x8f9   : > { %v1568_v13 = vpop.f32.mrf.mxu1 }
 0x8fa   : > { %v3101_v18 = vpack.i.bf16 %v1644_v6, %v1568_v13 }
 0x8fb   : > { %v2914_v19 = vpop.f32.mrf.mxu1 }
 0x8fd   : > { %v1722_v20 = vpop.f32.mrf.mxu1 }
 0x8fe   : > { %v1804_v22 = vsel %vm817_vm4, %v1722_v20, -inf }
 0x8ff   : > { %1805 = vmax.xlane.f32.xlu1 %v1804_v22  ;;  %v2924_v23 = vpop.f32.mrf.mxu1 }
 0x97c   : > { %v1809_v26 = vpop.xlane.xlu0 %1808 }
 0x97d   : > { %v1811_v27 = vsub.f32 %v1800_v8, %v1809_v26 }
 0x97f   : > { %v1814_v28 = vmul.f32 1.442695, %v1811_v27 }
 0x981   : > { %3163 = vpow2.f32 %v1814_v28 }
 0x988   : > { %v1806_v30 = vpop.xlane.xlu1 %1805 }
 0x989   : > { %v1810_v31 = vsub.f32 %v1722_v20, %v1806_v30 }
 0x98b   : > { %v1812_v32 = vmul.f32 1.442695, %v1810_v31 }
 0x98d   : > { %3165 = vpow2.f32 %v1812_v32  ;;  %v3127_v32 = vld [vmem:[%s3666_s26 + $0x18] sm:$0xff]  }
 0x98e   : > { %v3164_v33 = vpop.eup %3163 }
 0x98f   : > { %v1819_v34 = vsel %vm817_vm4, %v3164_v33, 0.0 }
 0x990   : > { %1820 = vadd.xlane.f32.xlu1 %v1819_v34  ;;  %v3129_v34 = vld [vmem:[%s3666_s26 + $0x8] sm:$0xff]  }
 0x99a   : > { %v3166_v35 = vpop.eup %3165 }
 0x99b   : > { %v1816_v37 = vsel %vm817_vm4, %v3166_v35, 0.0 }
 0x99c   : > { %1817 = vadd.xlane.f32.xlu0 %v1816_v37  ;;  %v3131_v37 = vld [vmem:[%s3697_s7 + $0x38] sm:$0xff]  }
 0x9a1   : > { %1902 = vrot.lane.b32.xlu1 %v3763_v55, %s3413_s22 }
 0x9a5   : > { %3097 = vrot.lane.b32.xlu1 %v3096_v42, %s3412_s23  ;;  %v3123_v42 = vld [vmem:[%s3688_s16 + $0x18] sm:$0xff]  }
 0x9b2   : > { %1826 = vrot.lane.b32.xlu0 %v3738_v29, %s3413_s22 }
 0x9b6   : > { %3102 = vrot.lane.b32.xlu0 %v3101_v18, %s3410_s19 }
 0xa19   : > { %v1821_v38 = vpop.xlane.xlu1 %1820 }
 0xa1a   : > { %3167 = vrcp.f32 %v1821_v38  ;;  %v3132_v38 = vld [vmem:[%s3697_s7 + $0x30] sm:$0xff]  }
 0xa1d   : > { %v1903_v39 = vpop.permute.xlu1 %1902 }
 0xa1e   : > { %2936 = vmatpush3.msra.mxu0 %v1903_v39  ;;  %v3133_v39 = vld [vmem:[%s3697_s7 + $0x28] sm:$0xff]  }
 0xa1f   : > { %2940 = vmatprep.subr.bf16.mxu0 %v3405_v14 }
 0xa21   : > { %v3098_v52 = vpop.permute.xlu1 %3097 }
 0xa22   : > { %v3100_v54 = vunpack.i.h.bf16 %v3098_v52  ;;  %v3099_v56 = vunpack.i.l.bf16 %v3098_v52 }
 0xa24   : > { %v2003_v59 = vsel %vm665_vm3, %v3781_v63, %v3100_v54  ;;  %v2002_v60 = vsel %vm665_vm3, %v3779_v61, %v3099_v56  ;;  %v2022_v63 = vrot.slane %v3894_v5, %v567_v17 }
 0xa25   : > { %v1818_v40 = vpop.xlane.xlu0 %1817 }
 0xa26   : > { %3169 = vrcp.f32 %v1818_v40  ;;  %v3134_v40 = vld [vmem:[%s3697_s7 + $0x20] sm:$0xff]  }
 0xa27   : > { %v3168_v55 = vpop.eup %3167 }
 0xa28   : > { %v1825_v43 = vmul.f32 %v3168_v55, %v3164_v33  ;;  %v3128_v33 = vld [vmem:[%s3666_s26 + $0x10] sm:$0xff]   ;;  %v3135_v55 = vld [vmem:[%s3697_s7 + $0x18] sm:$0xff]  }
 0xa29   : > { %v1827_v36 = vpop.permute.xlu0 %1826 }
 0xa2a   : > { %2931 = vmatpush3.msra.mxu1 %v1827_v36  ;;  %2938 = vmatmul.mubr.msk.f32.vlgmr.msra.gmra.mxu0 %vm817_vm4, %v1825_v43 }
 0xa2b   : > { %2948 = vmatprep.mubr.msk.bf16.mxu0 %vm3406_vm2, %v3405_v14  ;;  %2964 = vmatprep.subr.bf16.mxu1 %v3405_v14 }
 0xa2c   : > { %2941 = vmatpush3.bf16.msra.mxu0 %v3123_v42 }
 0xa2d   : > { %2942 = vmatprep.subr.bf16.mxu0 %v3405_v14  ;;  %v3103_v53 = vpop.permute.xlu0 %3102 }
 0xa2e   : > { %v3105_v21 = vunpack.i.h.bf16 %v3103_v53  ;;  %v3104_v57 = vunpack.i.l.bf16 %v3103_v53 }
 0xa30   : > { %2943 = vmatpush3.bf16.msra.mxu0 %v3124_v44  ;;  %v2005_v1 = vsel %vm2004_vm5, %v2002_v60, %v3104_v57  ;;  %v2006_v24 = vsel %vm2004_vm5, %v2003_v59, %v3105_v21  ;;  %v3136_v57 = vld [vmem:[%s3697_s7 + $0x10] sm:$0xff]   ;;  %v2769_v59 = vld [vmem:[%s535_s12] ss:$0 sm:$0xff] }
 0xa31   : > { %2944 = vmatprep.subr.bf16.mxu0 %v3405_v14 }
 0xa33   : > { %v3170_v29 = vpop.eup %3169 }
 0xa34   : > { %v1824_v41 = vmul.f32 %v3170_v29, %v3166_v35  ;;  %2945 = vmatpush3.bf16.msra.mxu0 %v3125_v45  ;;  %v3130_v35 = vld [vmem:[%s3666_s26] sm:$0xff]  }
 0xa35   : > { %2946 = vmatprep.subr.bf16.mxu0 %v3405_v14 }
 0xa36   : > { %2933 = vmatmul.mubr.msk.f32.vlgmr.msra.gmra.mxu1 %vm817_vm4, %v1824_v41 }
 0xa37   : > { %2980 = vmatprep.mubr.msk.bf16.mxu1 %vm3406_vm2, %v3405_v14  ;;  %2965 = vmatpush3.bf16.msra.mxu1 %v3131_v37 }
 0xa38   : > { %2947 = vmatpush3.bf16.msra.mxu0 %v3126_v48  ;;  %2966 = vmatprep.subr.bf16.mxu1 %v3405_v14  ;;  %v2128_v48 = vsub.s32 2, %v3711_v16 }
 0xa39   : > { %2952 = vmatprep.subr.bf16.mxu0 %v3405_v14 }
 0xa3a   : > { %v2129_v52 = vrot.slane %v3894_v5, %v2128_v48 }
 0xa3b   : > { %2967 = vmatpush3.bf16.msra.mxu1 %v3132_v38 }
 0xa3c   : > { %2968 = vmatprep.subr.bf16.mxu1 %v3405_v14 }
 0xa3f   : > { %2969 = vmatpush3.bf16.msra.mxu1 %v3133_v39 }
 0xa40   : > { %2970 = vmatprep.subr.bf16.mxu1 %v3405_v14 }
 0xa43   : > { %2971 = vmatpush3.bf16.msra.mxu1 %v3134_v40  ;;  %v2358_v40 = vsub.s32 4, %v3711_v16 }
 0xa44   : > { %2972 = vmatprep.subr.bf16.mxu1 %v3405_v14 }
 0xa47   : > { %2973 = vmatpush3.bf16.msra.mxu1 %v3135_v55  ;;  %v2364_v55 = vsub.s32 5, %v3711_v16 }
 0xa48   : > { %2974 = vmatprep.subr.bf16.mxu1 %v3405_v14 }
 0xa4b   : > { %2975 = vmatpush3.bf16.msra.mxu1 %v3136_v57 }
 0xa4c   : > { %2976 = vmatprep.subr.bf16.mxu1 %v3405_v14 }
 0xaea   : > { %v1974_v46 = vpop.f32.mrf.mxu0 }
 0xaec   : > { %v2939_v47 = vpop.f32.mrf.mxu0 }
 0xaf6   : > { %v1898_v49 = vpop.f32.mrf.mxu1 }
 0xaf7   : > { %v3106_v50 = vpack.i.bf16 %v1974_v46, %v1898_v49  ;;  %v2123_v46 = vrot.slane %v3894_v5, %v571_v25  ;;  %v3137_v25 = vld [vmem:[%s3697_s7 + $0x8] sm:$0xff]  }
 0xaf8   : > { %v2934_v51 = vpop.f32.mrf.mxu1  ;;  %2977 = vmatpush3.bf16.msra.mxu1 %v3137_v25 }
 0xaf9   : > { %3107 = vrot.lane.b32.xlu1 %v3106_v50, %s3408_s25  ;;  %2978 = vmatprep.subr.bf16.mxu1 %v3405_v14 }
 0xb6b   : > { %v3108_v58 = vpop.permute.xlu1 %3107 }
 0xb6c   : > { %v3110_v62 = vunpack.i.h.bf16 %v3108_v58  ;;  %v3109_v0 = vunpack.i.l.bf16 %v3108_v58  ;;  %v3138_v58 = vld [vmem:[%s3697_s7] sm:$0xff]  }
 0xb6d   : > { %2979 = vmatpush3.bf16.msra.mxu1 %v3138_v58 }
 0xb6e   : > { %v2009_v2 = vsel %vm2007_vm6, %v2006_v24, %v3110_v62  ;;  %v2008_v3 = vsel %vm2007_vm6, %v2005_v1, %v3109_v0 }
 0xb6f   : > { %v2010_v4 = vpack.c.bf16 %v2009_v2, %v2008_v3 }
 0xb71   : > { %2949 = vmatmul.mubr.msk.bf16.vlgmr.msra.gmra.mxu0 %vm615_vm1, %v2010_v4 }
 0xb72   : > { %2960 = vmatprep.mubr.msk.bf16.mxu0 %vm3406_vm2, %v3405_v14  ;;  %2953 = vmatpush3.bf16.msra.mxu0 %v3127_v32 }
 0xb73   : > { %2954 = vmatprep.subr.bf16.mxu0 %v3405_v14 }
 0xb76   : > { %2955 = vmatpush3.bf16.msra.mxu0 %v3128_v33 }
 0xb77   : > { %2956 = vmatprep.subr.bf16.mxu0 %v3405_v14 }
 0xb7a   : > { %2957 = vmatpush3.bf16.msra.mxu0 %v3129_v34 }
 0xb7b   : > { %2958 = vmatprep.subr.bf16.mxu0 %v3405_v14 }
 0xb7e   : > { %2959 = vmatpush3.bf16.msra.mxu0 %v3130_v35 }
 0xc31   : > { %v2084_v6 = vpop.f32.mrf.mxu0 }
 0xc32   : > { %v2085_v61 = vadd.f32 %v2084_v6, %v2022_v63  ;;  %v2237_v6 = vsub.s32 3, %v3711_v16 }
 0xc33   : > { %v2950_v7 = vpop.f32.mrf.mxu0 }
 0xc34   : > { %v2091_v8 = vadd.f32 %v2085_v61, %v3701_v11  ;;  %v2238_v14 = vrot.slane %v3894_v5, %v2237_v6 }
 0xc35   : > { %v2087_v9 = vpop.f32.mrf.mxu0 }
 0xc36   : > { %v2088_v10 = vadd.f32 %v2087_v9, %v2022_v63  ;;  %v2093_v13 = vsel %vm615_vm1, %v2091_v8, 0.0 }
 0xc37   : > { %2094 = vadd.xlane.f32.xlu0 %v2093_v13  ;;  %v2951_v18 = vpop.f32.mrf.mxu0 }
 0xc38   : > { %v2092_v19 = vadd.f32 %v2088_v10, %v3703_v12 }
 0xc3a   : > { %v2096_v20 = vsel %vm615_vm1, %v2092_v19, 0.0 }
 0xc3b   : > { %2097 = vadd.xlane.f32.xlu1 %v2096_v20 }
 0xcc0   : > { %v2095_v22 = vpop.xlane.xlu0 %2094 }
 0xcc1   : > { %v2100_v17 = vmul.f32 0.015625, %v2095_v22 }
 0xcc3   : > { %v2102_v23 = vsub.f32 %v2091_v8, %v2100_v17 }
 0xcc4   : > { %v2098_v26 = vpop.xlane.xlu1 %2097 }
 0xcc5   : > { %v2101_v27 = vmul.f32 0.015625, %v2098_v26  ;;  %v2104_v11 = vmul.f32 %v2102_v23, %v2102_v23 }
 0xcc7   : > { %v2103_v28 = vsub.f32 %v2092_v19, %v2101_v27  ;;  %v2106_v30 = vsel %vm615_vm1, %v2104_v11, 0.0 }
 0xcc8   : > { %2107 = vadd.xlane.f32.xlu0 %v2106_v30 }
 0xcc9   : > { %v2105_v31 = vmul.f32 %v2103_v28, %v2103_v28 }
 0xccb   : > { %v2109_v12 = vsel %vm615_vm1, %v2105_v31, 0.0 }
 0xccc   : > { %2110 = vadd.xlane.f32.xlu0 %v2109_v12 }
 0xd51   : > { %v2108_v43 = vpop.xlane.xlu0 %2107 }
 0xd52   : > { %v2112_v36 = vmul.f32 0.015625, %v2108_v43  ;;  %v2359_v43 = vrot.slane %v3894_v5, %v2358_v40 }
 0xd54   : > { %v2114_v29 = vadd.f32 1e-05, %v2112_v36 }
 0xd55   : > { %v2111_v41 = vpop.xlane.xlu0 %2110 }
 0xd56   : > { %3171 = vrsqrt.f32 %v2114_v29  ;;  %v2113_v42 = vmul.f32 0.015625, %v2111_v41  ;;  %v2365_v29 = vrot.slane %v3894_v5, %v2364_v55 }
 0xd58   : > { %v2115_v44 = vadd.f32 1e-05, %v2113_v42 }
 0xd5a   : > { %3173 = vrsqrt.f32 %v2115_v44 }
 0xd63   : > { %v3172_v45 = vpop.eup %3171 }
 0xd64   : > { %v2118_v47 = vmul.f32 %v3172_v45, %v2102_v23 }
 0xd66   : > { %v2124_v51 = vmul.f32 %v2123_v46, %v2118_v47 }
 0xd67   : > { %v3174_v49 = vpop.eup %3173 }
 0xd68   : > { %v2119_v50 = vmul.f32 %v3174_v49, %v2103_v28  ;;  %v2130_v54 = vadd.f32 %v2129_v52, %v2124_v51 }
 0xd6a   : > { %v2125_v53 = vmul.f32 %v2123_v46, %v2119_v50 }
 0xd6c   : > { %v2131_v56 = vadd.f32 %v2129_v52, %v2125_v53 }
 0xd6e   : > { %v2132_v21 = vpack.c.bf16 %v2131_v56, %v2130_v54 }
 0xd70   : > { %2961 = vmatmul.mubr.msk.bf16.vlgmr.msra.gmra.mxu0 %vm615_vm1, %v2132_v21 }
 0xe30   : > { %v2209_v60 = vpop.f32.mrf.mxu0 }
 0xe31   : > { %v2210_v0 = vadd.f32 %v2769_v59, %v2209_v60 }
 0xe32   : > { %v2962_v62 = vpop.f32.mrf.mxu0 }
 0xe33   : > { %v2216_v3 = vmax.f32 %v2210_v0, 0.0 }
 0xe34   : > { %v2212_v1 = vpop.f32.mrf.mxu0 }
 0xe35   : > { %v2213_v24 = vadd.f32 %v2769_v59, %v2212_v1 }
 0xe36   : > { %v2963_v2 = vpop.f32.mrf.mxu0 }
 0xe37   : > { %v2217_v4 = vmax.f32 %v2213_v24, 0.0 }
 0xe39   : > { %v2218_v63 = vpack.c.bf16 %v2217_v4, %v2216_v3 }
 0xe3b   : > { %2981 = vmatmul.mubr.bf16.vlgmr.msra.gmra.mxu1 %v2218_v63 }
 0xefb   : > { %v2321_v61 = vpop.f32.mrf.mxu1 }
 0xefc   : > { %v2322_v7 = vadd.f32 %v2321_v61, %v2238_v14 }
 0xefd   : > { %v2982_v8 = vpop.f32.mrf.mxu1 }
 0xefe   : > { %v2328_v9 = vadd.f32 %v2322_v7, %v2130_v54 }
 0xeff   : > { %v2324_v10 = vpop.f32.mrf.mxu1 }
 0xf00   : > { %v2325_v13 = vadd.f32 %v2324_v10, %v2238_v14  ;;  %v2330_v18 = vsel %vm615_vm1, %v2328_v9, 0.0 }
 0xf01   : > { %2331 = vadd.xlane.f32.xlu1 %v2330_v18  ;;  %v2983_v19 = vpop.f32.mrf.mxu1 }
 0xf02   : > { %v2329_v20 = vadd.f32 %v2325_v13, %v2131_v56 }
 0xf04   : > { %v2333_v22 = vsel %vm615_vm1, %v2329_v20, 0.0 }
 0xf05   : > { %2334 = vadd.xlane.f32.xlu0 %v2333_v22 }
 0xf8a   : > { %v2332_v17 = vpop.xlane.xlu1 %2331 }
 0xf8b   : > { %v2336_v23 = vmul.f32 0.015625, %v2332_v17 }
 0xf8d   : > { %v2338_v26 = vsub.f32 %v2328_v9, %v2336_v23 }
 0xf8e   : > { %v2335_v27 = vpop.xlane.xlu0 %2334 }
 0xf8f   : > { %v2337_v11 = vmul.f32 0.015625, %v2335_v27  ;;  %v2340_v28 = vmul.f32 %v2338_v26, %v2338_v26 }
 0xf91   : > { %v2339_v30 = vsub.f32 %v2329_v20, %v2337_v11  ;;  %v2342_v31 = vsel %vm615_vm1, %v2340_v28, 0.0 }
 0xf92   : > { %2343 = vadd.xlane.f32.xlu1 %v2342_v31 }
 0xf93   : > { %v2341_v12 = vmul.f32 %v2339_v30, %v2339_v30 }
 0xf95   : > { %v2345_v32 = vsel %vm615_vm1, %v2341_v12, 0.0 }
 0xf96   : > { %2346 = vadd.xlane.f32.xlu0 %v2345_v32 }
0x101b   : > { %v2344_v33 = vpop.xlane.xlu1 %2343 }
0x101c   : > { %v2348_v34 = vmul.f32 0.015625, %v2344_v33 }
0x101e   : > { %v2350_v35 = vadd.f32 1e-05, %v2348_v34 }
0x101f   : > { %v2347_v37 = vpop.xlane.xlu0 %2346 }
0x1020   : > { %3175 = vrsqrt.f32 %v2350_v35  ;;  %v2349_v38 = vmul.f32 0.015625, %v2347_v37 }
0x1022   : > { %v2351_v39 = vadd.f32 1e-05, %v2349_v38 }
0x1024   : > { %3177 = vrsqrt.f32 %v2351_v39 }
0x102d   : > { %v3176_v36 = vpop.eup %3175 }
0x102e   : > { %v2354_v41 = vmul.f32 %v3176_v36, %v2338_v26 }
0x1030   : > { %v2360_v42 = vmul.f32 %v2359_v43, %v2354_v41 }
0x1031   : > { %v3178_v44 = vpop.eup %3177 }
0x1032   : > { %v2366_v45 = vadd.f32 %v2365_v29, %v2360_v42  ;;  %v2355_v46 = vmul.f32 %v3178_v44, %v2339_v30 }
0x1034   : > { %2368 = vst.msk [vmem:[#allocation2] sm:$0xff] %vm615_vm1, %v2366_v45  ;;  %v2361_v47 = vmul.f32 %v2359_v43, %v2355_v46  ;;  %2373 = sbr.rel (%p2783_p11) target bundleno = 4552 (0x11c8), region = 88 }
0x1036   : > { %v2367_v48 = vadd.f32 %v2365_v29, %v2361_v47 }
0x1038   : > { %2369 = vst.msk [vmem:[#allocation2 + $0x8] sm:$0xff] %vm615_vm1, %v2367_v48 }
0x1039   : > { %v2375_v49 = vand.u32 127, %v565_v15  ;;  %v2378_v50 = vmul.u32 8, %v3711_v16  ;;  %v3414_v51 = vmov 0.0   ;;  %vm3415_vm7 = vmmov 0   ;;  %v3179_v5 = vld [vmem:[#allocation11 + $0x18] sm:$0xff]   ;;  %v3180_v53 = vld [vmem:[#allocation11 + $0x10] sm:$0xff]  }
0x103a   : > { %2984 = vmatprep.subr.mxu0 %v3414_v51  ;;  %2988 = vmatprep.mubr.msk.f32.mxu0 %vm3415_vm7, %v3414_v51  ;;  %v3181_v15 = vld [vmem:[#allocation11 + $0x8] sm:$0xff]   ;;  %v3182_v16 = vld [vmem:[#allocation11] sm:$0xff]  }
0x103b   : > { %2985 = vmatpush3.msra.mxu0 %v2367_v48  ;;  %vm2379_vm8 = vcmp.eq.s32.totalorder %v2375_v49, %v2378_v50  ;;  %2991 = vmatprep.subr.bf16.mxu1 %v3414_v51  ;;  %v2786_v57 = vld [vmem:[%s4037_s18] ss:$0 sm:$0xff] }
0x103c   : > { %2986 = vmatprep.subr.mxu0 %v3414_v51  ;;  %v2784_v52 = vsel %vm2379_vm8, 1.0, %v3414_v51  ;;  %2992 = vmatpush3.bf16.msra.mxu1 %v3179_v5 }
0x103d   : > { %2987 = vmatpush3.msra.mxu0 %v2366_v45  ;;  %2993 = vmatprep.subr.bf16.mxu1 %v3414_v51 }
0x103e   : > { %2989 = vmatmul.mubr.msk.f32.vlgmr.msra.gmra.mxu0 %vm665_vm3, %v2784_v52  ;;  %2999 = vmatprep.mubr.msk.bf16.mxu1 %vm3415_vm7, %v3414_v51 }
0x1040   : > { %2994 = vmatpush3.bf16.msra.mxu1 %v3180_v53 }
0x1041   : > { %2995 = vmatprep.subr.bf16.mxu1 %v3414_v51 }
0x1044   : > { %2996 = vmatpush3.bf16.msra.mxu1 %v3181_v15 }
0x1045   : > { %2997 = vmatprep.subr.bf16.mxu1 %v3414_v51 }
0x1048   : > { %2998 = vmatpush3.bf16.msra.mxu1 %v3182_v16 }
0x10fe   : > { %v2451_v54 = vpop.f32.mrf.mxu0 }
0x10ff   : > { %v2455_v56 = vpack.c.bf16 %v2451_v54, %v2451_v54 }
0x1100   : > { %v2990_v21 = vpop.f32.mrf.mxu0 }
0x1101   : > { %3000 = vmatmul.mubr.msk.bf16.vlgmr.msra.gmra.mxu1 %vm615_vm1, %v2455_v56 }
0x11c1   : > { %v2532_v25 = vpop.f32.mrf.mxu1 }
0x11c2   : > { %v2533_v58 = vadd.f32 %v2786_v57, %v2532_v25 }
0x11c3   : > { %v3001_v59 = vpop.f32.mrf.mxu1 }
0x11c4   : > { %2538 = vst [vmem:[#allocation12] sm:$0x3] %v2533_v58 }
0x11c5   : > { %v2535_v60 = vpop.f32.mrf.mxu1 }
0x11c7   : > { %v3002_v62 = vpop.f32.mrf.mxu1 }
0x11c8 PF: > { %p3043_p12 = scmp.eq.s32.totalorder %s3491_s17, 1  ;;  %s3416_s9 = smov [#allocation12]  }
0x11c9   : > { %s2546_s15 = sshll.u32 %s3416_s9, 4  ;;  %s2547_s15 = int_to_ptr.vmem [resolvable:$true] %s2546_s15 }
0x11ca   : > { %s3319_s16 = scalar_lea.vmem %s2547_s15, 32  ;;  %p3326_p1 = scmp.lt.s32.totalorder %s2547_s15, %s2547_s15 }
0x11cb   : > { %p3320_p13 = scmp.ne.s32.totalorder %s2547_s15, %s3319_s16  ;;  %p3327_p3 = scmp.lt.s32.totalorder %s3319_s16, %s3319_s16 }
0x11cd   : > { %p3321_p2 = pnand %p3320_p13, %p3043_p12  ;;  %p3328_p4 = por %p3327_p3, %p3326_p1 }
0x11cf   : > { %p3322_p7 = pneg %p3321_p2 }
0x11d1   : > { %p3329_p9 = pnand %p3328_p4, %p3322_p7 }
0x11d3   : > { %3332 = shalt.err (!%p3329_p9)
}
0x11d4   : > { %s4038_s11 = sld [smem:[#allocation26_spill]] }
0x11da   : > { %3018 = dma.vmem_to_hbm [thread:$0]  (%p3043_p12), %s2547_s15, 32, %s4038_s11, [#allocation5]  }
0x11db   : > { %3376 = dma.done.wait (%p3043_p12), [#allocation5], 32  }
0x11dc   : > { %3378 = vsyncadd (%p3043_p12), [#allocation5], 4294967264 }
0x11dd PF: > { %s4039_s16 = sld [smem:[#allocation19_spill]]  ;;  %s4042_s13 = smov %s3385_s14 }
0x11de   : > { %s4040_s12 = sld [smem:[#allocation18_spill]] }
0x11df   : > { %s4041_s15 = sld [smem:[#allocation20_spill]] }
0x11e3   : > { %p25_p10 = scmp.ge.s32.totalorder %s4039_s16, 4  }
0x11e4   : > { %s4043_s14 = smov %s4040_s12 }
0x11e5   :  { %27 = sbr.rel (!%p25_p10) target bundleno = 14 (0xe), region = 150 }
0x11ea   :  { %2559 = vsyncpa [#allocation4], 1 }
0x11eb   :  { %2561 = vsyncpa [#allocation4 + $0x1], 1 }
0x11ec   :  { %2562 = vsyncpa [#allocation7], 1 }
0x11ed   :  { %2564 = vsyncpa [#allocation7 + $0x1], 1 }
0x11ee   :  { %2565 = vsyncpa [#allocation10], 1 }
0x11ef   :  { %2567 = vsyncpa [#allocation10 + $0x1], 1 }
0x11f0   :  { %2568 = vsyncpa [#allocation5], 1 }
0x11f1   :  { %2570 = vsyncpa [#allocation5 + $0x1], 1 }

</bundles_post_ra>
